<compile_context>
chip_gen: v7x
topology: tpu7x:2x2x1
jax: 0.10.0
libtpu: 0.0.40
codegen_flags: <defaults>
</compile_context>

<pallas_src>
import functools

import jax
import jax.numpy as jnp
from jax import lax
from jax.experimental import pallas as pl
from jax.experimental.pallas import tpu as pltpu


def _dwconv_nhwc_kernel(x_ref, w_ref, o_ref, xpad_ref, *, ksize, dil, stride,
                        pad, h_out, w_out):
    """One (batch, channel-block) grid step.

    x_ref:    (1, H, W, Cb)        VMEM input tile (unpadded)
    w_ref:    (ksize*ksize, Cb)    VMEM per-channel tap weights
    o_ref:    (1, Hout, Wout, Cb)  VMEM output tile
    xpad_ref: (H+2p, W+2p, Cb)     VMEM scratch: zero-padded plane (f32)
    """
    h_in, w_in = x_ref.shape[1], x_ref.shape[2]
    cb = x_ref.shape[3]

    # Build the zero-padded plane on-chip (padding fused into the kernel:
    # no extra HBM traffic, only a cheap VMEM->VMEM copy).
    xpad_ref[...] = jnp.zeros(xpad_ref.shape, xpad_ref.dtype)
    xpad_ref[pl.ds(pad, h_in), pl.ds(pad, w_in), :] = (
        x_ref[0, :, :, :].astype(jnp.float32))

    # Depthwise conv = sum over k*k taps of (shifted plane) * (per-channel tap
    # vector).  Channels sit on the 128-lane axis, so each tap is a plain
    # lane-wise VPU multiply-add; the MXU is useless at k*k = 9 reduction depth.
    # Accumulate in f32 registers and store once at the end.
    acc = jnp.zeros((h_out, w_out, cb), jnp.float32)
    for kh in range(ksize):
        for kw in range(ksize):
            if stride == 1:
                patch = xpad_ref[pl.ds(kh * dil, h_out),
                                 pl.ds(kw * dil, w_out), :]
            else:
                # Strides land on the row/sublane axes (never the lane axis).
                # TODO(synk): stride > 1 path is untested here (module default
                # is stride=1); verify strided pl.ds lowering before relying on it.
                patch = xpad_ref[pl.ds(kh * dil, h_out, stride),
                                 pl.ds(kw * dil, w_out, stride), :]
            tap = w_ref[kh * ksize + kw, :].astype(jnp.float32)  # (Cb,) lanes
            acc = acc + patch * tap
    o_ref[0, :, :, :] = acc.astype(o_ref.dtype)


def _pick_channel_block(C, h_in, w_in, h_out, w_out, pad, itemsize,
                        budget_bytes=12 * 1024 * 1024):
    """Largest legal channel block whose per-step VMEM footprint fits budget.

    Legal blocks: full C, or a multiple of 128 that divides C (lane tiling rule).
    """
    hp, wp = h_in + 2 * pad, w_in + 2 * pad
    cands = sorted({C} | {cb for cb in (512, 256, 128) if C % cb == 0},
                   reverse=True)
    for cb in cands:
        need = cb * (2 * h_in * w_in * itemsize            # double-buffered input
                     + 2 * h_out * w_out * itemsize        # double-buffered output
                     + (hp * wp + h_out * w_out) * 4)      # pad scratch + f32 acc
        if need <= budget_bytes:
            return cb
    # TODO(synk): add halo'd row-band spatial tiling for planes too large to fit
    # VMEM even at the smallest channel block (mandatory for huge H*W on v7x).
    return cands[-1]


def channelwise_dilated_conv_nhwc(x, weight, *, ksize, stride=1, d=1):
    """Depthwise dilated conv on channels-last input (the lane-dense fast path).

    x:      (N, H, W, C)
    weight: (C, ksize, ksize)   (Conv2d groups=nIn weight (nOut,1,k,k) squeezed)
    returns (N, Hout, Wout, C)
    """
    N, H, W, C = x.shape
    assert weight.shape == (C, ksize, ksize), (weight.shape, C, ksize)
    pad = ((ksize - 1) // 2) * d  # PyTorch: int((kSize - 1) / 2) * d
    h_out = (H + 2 * pad - d * (ksize - 1) - 1) // stride + 1
    w_out = (W + 2 * pad - d * (ksize - 1) - 1) // stride + 1

    # (C, k, k) -> (k*k, C): tap index on sublanes, channels on lanes.
    w_taps = jnp.transpose(weight, (1, 2, 0)).reshape(ksize * ksize, C)
    w_taps = w_taps.astype(jnp.float32)

    cb = _pick_channel_block(C, H, W, h_out, w_out, pad, x.dtype.itemsize)
    grid = (N, C // cb)

    kernel = functools.partial(
        _dwconv_nhwc_kernel, ksize=ksize, dil=d, stride=stride, pad=pad,
        h_out=h_out, w_out=w_out)

    return pl.pallas_call(
        kernel,
        out_shape=jax.ShapeDtypeStruct((N, h_out, w_out, C), x.dtype),
        grid_spec=pltpu.PrefetchScalarGridSpec(
            num_scalar_prefetch=0,
            grid=grid,
            in_specs=[
                pl.BlockSpec((1, H, W, cb), lambda n, c: (n, 0, 0, c)),
                pl.BlockSpec((ksize * ksize, cb), lambda n, c: (0, c)),
            ],
            out_specs=pl.BlockSpec((1, h_out, w_out, cb),
                                   lambda n, c: (n, 0, 0, c)),
            scratch_shapes=[
                pltpu.VMEM((H + 2 * pad, W + 2 * pad, cb), jnp.float32),
            ],
        ),
        compiler_params=pltpu.CompilerParams(
            dimension_semantics=("parallel", "parallel"),
            vmem_limit_bytes=32 * 1024 * 1024,
        ),
    )(x, w_taps)


def channelwise_dilated_conv(x, weight, *, ksize, stride=1, d=1):
    """PyTorch-layout (NCHW) entry point matching ChannelWiseDilatedConv.forward.

    The kernel itself runs channels-last; the transposes below are layout
    plumbing for PyTorch parity.  Callers that already keep activations in
    NHWC should call `channelwise_dilated_conv_nhwc` directly and skip them.
    """
    x_nhwc = jnp.transpose(x, (0, 2, 3, 1))
    out = channelwise_dilated_conv_nhwc(
        x_nhwc, weight, ksize=ksize, stride=stride, d=d)
    return jnp.transpose(out, (0, 3, 1, 2))


def _reference(x, weight, *, ksize, stride, d):
    """Pure-JAX reference = torch.nn.Conv2d(groups=nIn, dilation=d, bias=False)."""
    C = x.shape[1]
    pad = ((ksize - 1) // 2) * d
    w_oihw = weight.reshape(C, 1, ksize, ksize)
    return lax.conv_general_dilated(
        x, w_oihw,
        window_strides=(stride, stride),
        padding=((pad, pad), (pad, pad)),
        rhs_dilation=(d, d),
        dimension_numbers=("NCHW", "OIHW", "NCHW"),
        feature_group_count=C,
    )


if __name__ == "__main__":
    # Small shapes consistent with the module: nIn == nOut == 4, kSize=3.
    N, C, H, W = 2, 4, 16, 16
    kSize = 3

    key = jax.random.PRNGKey(0)
    kx, kw = jax.random.split(key)
    x = jax.random.normal(kx, (N, C, H, W), dtype=jnp.float32)
    # Deterministic synthetic weight (Conv2d weight (nOut, 1, k, k) squeezed).
    weight = jax.random.normal(kw, (C, kSize, kSize), dtype=jnp.float32) * 0.1

    for (stride, d) in ((1, 2), (1, 1)):
        out = channelwise_dilated_conv(x, weight, ksize=kSize, stride=stride, d=d)
        out = jax.block_until_ready(out)
        ref = _reference(x, weight, ksize=kSize, stride=stride, d=d)
        assert out.shape == ref.shape, (out.shape, ref.shape)
        assert jnp.allclose(out, ref, atol=1e-5, rtol=1e-5), float(
            jnp.max(jnp.abs(out - ref)))
    print("KERNEL_OK")
</pallas_src>

<mosaic_0001>
module attributes {stable_mosaic.version = 11 : i64} {
  func.func @_dwconv_nhwc_kernel(%arg0: i32, %arg1: i32, %arg2: memref<1x16x16x4xf32, #tpu.memory_space<vmem>>, %arg3: memref<9x4xf32, #tpu.memory_space<vmem>>, %arg4: memref<1x16x16x4xf32, #tpu.memory_space<vmem>>, %arg5: memref<20x20x4xf32, #tpu.memory_space<vmem>>) attributes {dimension_semantics = [#tpu.dimension_semantics<parallel>, #tpu.dimension_semantics<parallel>], iteration_bounds = array<i64: 2, 1>, scalar_prefetch = 0 : i64, scratch_operands = 1 : i64, tpu.core_type = #tpu.core_type<tc>, window_params = [{transform_indices = @transform_0, window_bounds = array<i64: 1, 16, 16, 4>}, {transform_indices = @transform_1, window_bounds = array<i64: 9, 4>}, {transform_indices = @transform_2, window_bounds = array<i64: 1, 16, 16, 4>}]} {
    %cst = arith.constant 0.000000e+00 : f32
    %0 = vector.broadcast %cst : f32 to vector<20x20x4xf32>
    %c0 = arith.constant 0 : index
    %c0_0 = arith.constant 0 : index
    %c0_1 = arith.constant 0 : index
    %1 = vector.load %arg5[%c0, %c0_0, %c0_1] : memref<20x20x4xf32, #tpu.memory_space<vmem>>, vector<20x20x4xf32>
    tpu.vector_store %arg5[%c0, %c0_0, %c0_1], %0 {strides = array<i32>} : memref<20x20x4xf32, #tpu.memory_space<vmem>>, vector<20x20x4xf32>,
    %c0_2 = arith.constant 0 : index
    %c0_3 = arith.constant 0 : index
    %c0_4 = arith.constant 0 : index
    %c0_5 = arith.constant 0 : index
    %2 = vector.load %arg2[%c0_2, %c0_3, %c0_4, %c0_5] : memref<1x16x16x4xf32, #tpu.memory_space<vmem>>, vector<1x16x16x4xf32>
    %3 = vector.shape_cast %2 : vector<1x16x16x4xf32> to vector<16x16x4xf32>
    %c2 = arith.constant 2 : index
    %c2_6 = arith.constant 2 : index
    %c0_7 = arith.constant 0 : index
    %4 = vector.load %arg5[%c2, %c2_6, %c0_7] : memref<20x20x4xf32, #tpu.memory_space<vmem>>, vector<16x16x4xf32>
    tpu.vector_store %arg5[%c2, %c2_6, %c0_7], %3 {strides = array<i32>} : memref<20x20x4xf32, #tpu.memory_space<vmem>>, vector<16x16x4xf32>,
    %cst_8 = arith.constant 0.000000e+00 : f32
    %5 = vector.broadcast %cst_8 : f32 to vector<16x16x4xf32>
    %c0_9 = arith.constant 0 : index
    %c0_10 = arith.constant 0 : index
    %c0_11 = arith.constant 0 : index
    %6 = vector.load %arg5[%c0_9, %c0_10, %c0_11] : memref<20x20x4xf32, #tpu.memory_space<vmem>>, vector<16x16x4xf32>
    %c0_12 = arith.constant 0 : index
    %c0_13 = arith.constant 0 : index
    %7 = vector.load %arg3[%c0_12, %c0_13] : memref<9x4xf32, #tpu.memory_space<vmem>>, vector<1x4xf32>
    %8 = vector.shape_cast %7 : vector<1x4xf32> to vector<4xf32>
    %9 = vector.shape_cast %8 : vector<4xf32> to vector<1x1x4xf32>
    %10 = vector.broadcast %9 : vector<1x1x4xf32> to vector<16x16x4xf32>
    %11 = arith.mulf %6, %10 : vector<16x16x4xf32>
    %12 = arith.addf %5, %11 : vector<16x16x4xf32>
    %c0_14 = arith.constant 0 : index
    %c2_15 = arith.constant 2 : index
    %c0_16 = arith.constant 0 : index
    %13 = vector.load %arg5[%c0_14, %c2_15, %c0_16] : memref<20x20x4xf32, #tpu.memory_space<vmem>>, vector<16x16x4xf32>
    %c1 = arith.constant 1 : index
    %c0_17 = arith.constant 0 : index
    %14 = vector.load %arg3[%c1, %c0_17] : memref<9x4xf32, #tpu.memory_space<vmem>>, vector<1x4xf32>
    %15 = vector.shape_cast %14 : vector<1x4xf32> to vector<4xf32>
    %16 = vector.shape_cast %15 : vector<4xf32> to vector<1x1x4xf32>
    %17 = vector.broadcast %16 : vector<1x1x4xf32> to vector<16x16x4xf32>
    %18 = arith.mulf %13, %17 : vector<16x16x4xf32>
    %19 = arith.addf %12, %18 : vector<16x16x4xf32>
    %c0_18 = arith.constant 0 : index
    %c4 = arith.constant 4 : index
    %c0_19 = arith.constant 0 : index
    %20 = vector.load %arg5[%c0_18, %c4, %c0_19] : memref<20x20x4xf32, #tpu.memory_space<vmem>>, vector<16x16x4xf32>
    %c2_20 = arith.constant 2 : index
    %c0_21 = arith.constant 0 : index
    %21 = vector.load %arg3[%c2_20, %c0_21] : memref<9x4xf32, #tpu.memory_space<vmem>>, vector<1x4xf32>
    %22 = vector.shape_cast %21 : vector<1x4xf32> to vector<4xf32>
    %23 = vector.shape_cast %22 : vector<4xf32> to vector<1x1x4xf32>
    %24 = vector.broadcast %23 : vector<1x1x4xf32> to vector<16x16x4xf32>
    %25 = arith.mulf %20, %24 : vector<16x16x4xf32>
    %26 = arith.addf %19, %25 : vector<16x16x4xf32>
    %c2_22 = arith.constant 2 : index
    %c0_23 = arith.constant 0 : index
    %c0_24 = arith.constant 0 : index
    %27 = vector.load %arg5[%c2_22, %c0_23, %c0_24] : memref<20x20x4xf32, #tpu.memory_space<vmem>>, vector<16x16x4xf32>
    %c3 = arith.constant 3 : index
    %c0_25 = arith.constant 0 : index
    %28 = vector.load %arg3[%c3, %c0_25] : memref<9x4xf32, #tpu.memory_space<vmem>>, vector<1x4xf32>
    %29 = vector.shape_cast %28 : vector<1x4xf32> to vector<4xf32>
    %30 = vector.shape_cast %29 : vector<4xf32> to vector<1x1x4xf32>
    %31 = vector.broadcast %30 : vector<1x1x4xf32> to vector<16x16x4xf32>
    %32 = arith.mulf %27, %31 : vector<16x16x4xf32>
    %33 = arith.addf %26, %32 : vector<16x16x4xf32>
    %c2_26 = arith.constant 2 : index
    %c2_27 = arith.constant 2 : index
    %c0_28 = arith.constant 0 : index
    %34 = vector.load %arg5[%c2_26, %c2_27, %c0_28] : memref<20x20x4xf32, #tpu.memory_space<vmem>>, vector<16x16x4xf32>
    %c4_29 = arith.constant 4 : index
    %c0_30 = arith.constant 0 : index
    %35 = vector.load %arg3[%c4_29, %c0_30] : memref<9x4xf32, #tpu.memory_space<vmem>>, vector<1x4xf32>
    %36 = vector.shape_cast %35 : vector<1x4xf32> to vector<4xf32>
    %37 = vector.shape_cast %36 : vector<4xf32> to vector<1x1x4xf32>
    %38 = vector.broadcast %37 : vector<1x1x4xf32> to vector<16x16x4xf32>
    %39 = arith.mulf %34, %38 : vector<16x16x4xf32>
    %40 = arith.addf %33, %39 : vector<16x16x4xf32>
    %c2_31 = arith.constant 2 : index
    %c4_32 = arith.constant 4 : index
    %c0_33 = arith.constant 0 : index
    %41 = vector.load %arg5[%c2_31, %c4_32, %c0_33] : memref<20x20x4xf32, #tpu.memory_space<vmem>>, vector<16x16x4xf32>
    %c5 = arith.constant 5 : index
    %c0_34 = arith.constant 0 : index
    %42 = vector.load %arg3[%c5, %c0_34] : memref<9x4xf32, #tpu.memory_space<vmem>>, vector<1x4xf32>
    %43 = vector.shape_cast %42 : vector<1x4xf32> to vector<4xf32>
    %44 = vector.shape_cast %43 : vector<4xf32> to vector<1x1x4xf32>
    %45 = vector.broadcast %44 : vector<1x1x4xf32> to vector<16x16x4xf32>
    %46 = arith.mulf %41, %45 : vector<16x16x4xf32>
    %47 = arith.addf %40, %46 : vector<16x16x4xf32>
    %c4_35 = arith.constant 4 : index
    %c0_36 = arith.constant 0 : index
    %c0_37 = arith.constant 0 : index
    %48 = vector.load %arg5[%c4_35, %c0_36, %c0_37] : memref<20x20x4xf32, #tpu.memory_space<vmem>>, vector<16x16x4xf32>
    %c6 = arith.constant 6 : index
    %c0_38 = arith.constant 0 : index
    %49 = vector.load %arg3[%c6, %c0_38] : memref<9x4xf32, #tpu.memory_space<vmem>>, vector<1x4xf32>
    %50 = vector.shape_cast %49 : vector<1x4xf32> to vector<4xf32>
    %51 = vector.shape_cast %50 : vector<4xf32> to vector<1x1x4xf32>
    %52 = vector.broadcast %51 : vector<1x1x4xf32> to vector<16x16x4xf32>
    %53 = arith.mulf %48, %52 : vector<16x16x4xf32>
    %54 = arith.addf %47, %53 : vector<16x16x4xf32>
    %c4_39 = arith.constant 4 : index
    %c2_40 = arith.constant 2 : index
    %c0_41 = arith.constant 0 : index
    %55 = vector.load %arg5[%c4_39, %c2_40, %c0_41] : memref<20x20x4xf32, #tpu.memory_space<vmem>>, vector<16x16x4xf32>
    %c7 = arith.constant 7 : index
    %c0_42 = arith.constant 0 : index
    %56 = vector.load %arg3[%c7, %c0_42] : memref<9x4xf32, #tpu.memory_space<vmem>>, vector<1x4xf32>
    %57 = vector.shape_cast %56 : vector<1x4xf32> to vector<4xf32>
    %58 = vector.shape_cast %57 : vector<4xf32> to vector<1x1x4xf32>
    %59 = vector.broadcast %58 : vector<1x1x4xf32> to vector<16x16x4xf32>
    %60 = arith.mulf %55, %59 : vector<16x16x4xf32>
    %61 = arith.addf %54, %60 : vector<16x16x4xf32>
    %c4_43 = arith.constant 4 : index
    %c4_44 = arith.constant 4 : index
    %c0_45 = arith.constant 0 : index
    %62 = vector.load %arg5[%c4_43, %c4_44, %c0_45] : memref<20x20x4xf32, #tpu.memory_space<vmem>>, vector<16x16x4xf32>
    %c8 = arith.constant 8 : index
    %c0_46 = arith.constant 0 : index
    %63 = vector.load %arg3[%c8, %c0_46] : memref<9x4xf32, #tpu.memory_space<vmem>>, vector<1x4xf32>
    %64 = vector.shape_cast %63 : vector<1x4xf32> to vector<4xf32>
    %65 = vector.shape_cast %64 : vector<4xf32> to vector<1x1x4xf32>
    %66 = vector.broadcast %65 : vector<1x1x4xf32> to vector<16x16x4xf32>
    %67 = arith.mulf %62, %66 : vector<16x16x4xf32>
    %68 = arith.addf %61, %67 : vector<16x16x4xf32>
    %c0_47 = arith.constant 0 : index
    %c0_48 = arith.constant 0 : index
    %c0_49 = arith.constant 0 : index
    %c0_50 = arith.constant 0 : index
    %69 = vector.load %arg4[%c0_47, %c0_48, %c0_49, %c0_50] : memref<1x16x16x4xf32, #tpu.memory_space<vmem>>, vector<1x16x16x4xf32>
    %70 = vector.shape_cast %69 : vector<1x16x16x4xf32> to vector<16x16x4xf32>
    %71 = vector.shape_cast %68 : vector<16x16x4xf32> to vector<1x16x16x4xf32>
    tpu.vector_store %arg4[%c0_47, %c0_48, %c0_49, %c0_50], %71 {strides = array<i32>} : memref<1x16x16x4xf32, #tpu.memory_space<vmem>>, vector<1x16x16x4xf32>,
    return
  }
  func.func @transform_0(%arg0: i32, %arg1: i32) -> (i32, i32, i32, i32) {
    %c0_i32 = arith.constant 0 : i32
    %c0_i32_0 = arith.constant 0 : i32
    %c0_i32_1 = arith.constant 0 : i32
    return %arg0, %c0_i32, %c0_i32_0, %arg1 : i32, i32, i32, i32
  }
  func.func @transform_1(%arg0: i32, %arg1: i32) -> (i32, i32) {
    %c0_i32 = arith.constant 0 : i32
    %c0_i32_0 = arith.constant 0 : i32
    return %c0_i32, %arg1 : i32, i32
  }
  func.func @transform_2(%arg0: i32, %arg1: i32) -> (i32, i32, i32, i32) {
    %c0_i32 = arith.constant 0 : i32
    %c0_i32_0 = arith.constant 0 : i32
    %c0_i32_1 = arith.constant 0 : i32
    return %arg0, %c0_i32, %c0_i32_0, %arg1 : i32, i32, i32, i32
  }
}

</mosaic_0001>

<bundles_post_ra>
// kernel: tpu_custom_call.1
= control target key start
LH: loop header
LB: loop body
LE: loop exit
PB: predicated region body
PF: predicated region fallthrough
CT: control target
= control target key end

     0   :  { %s1457_s9 = smov 0   ;;  %s1459_s10 = smov 0   ;;  %s2517_s0 = inlined_call_operand.vmem [shape: f32[2,16,16,4], index: 0, kind: input, shape index: {}]   ;;  %s2518_s1 = inlined_call_operand.vmem [shape: f32[9,4], index: 1, kind: input, shape index: {}]   ;;  %s2519_s2 = inlined_call_operand.vmem [shape: f32[2,16,16,4], index: 2, kind: output, shape index: {}]  }
   0x1   :  { %s1461_s11 = smov 0  }
   0x2 LB: > { %s24_s12 = sadd.s32 1, %s1435_s10  ;;  %p1365_p0 = scmp.ge.s32.totalorder %s1439_s11, 1  ;;  %s1439_s11 = sphi %s1461_s11, %s12_s11   ;;  %s1435_s10 = sphi %s1459_s10, %s2521_s10   ;;  %s1431_s9 = sphi %s1457_s9, %s2520_s9  }
   0x3   : > { %p26_p1 = scmp.ge.s32.totalorder %s24_s12, 2  ;;  %p140_p2 = scmp.lt.s32.totalorder %s1439_s11, 3 }
   0x5   : > { %s2523_s12 = smov (%p26_p1, %s24_s12), 0  ;;  %p141_p3 = pnand %p1365_p0, %p140_p2 }
   0x6   : > { %vm192_vm0 = vcmask (!%p141_p3), 31744   ;;  %vm195_vm1 = vcmask (!%p141_p3), 27648   ;;  %p172_p4 = scmp.lt.s32.totalorder (!%p141_p3), %s1431_s9, 1  ;;  %v1441_v0 = vmov (!%p141_p3), 0.0   ;;  %v1593_v22 = vld [vmem:[%s2518_s1] ss:$0 sm:$0xff] (!%p141_p3) }
   0x7   : > { %144 = sbr.rel (%p141_p3) target bundleno = 189 (0xbd), region = 28  ;;  %193 = vst.msk [vmem:[#allocation2] sm:$0xff] (!%p141_p3), %vm192_vm0, %v1441_v0  ;;  %194 = vst.msk [vmem:[#allocation2 + $0x8] sm:$0xff] (!%p141_p3), %vm192_vm0, %v1441_v0  ;;  %v1604_v26 = vld [vmem:[%s2518_s1 + $0x1] ss:$0 sm:$0xff] (!%p141_p3) }
   0x8   : > { %197 = vst.msk [vmem:[#allocation2 + $0x18] sm:$0xff] (!%p141_p3), %vm192_vm0, %v1441_v0  ;;  %198 = vst.msk [vmem:[#allocation2 + $0x20] sm:$0xff] (!%p141_p3), %vm192_vm0, %v1441_v0  ;;  %v1609_v27 = vld [vmem:[%s2518_s1 + $0x2] ss:$0 sm:$0xff] (!%p141_p3)  ;;  %v1626_v34 = vld [vmem:[%s2518_s1 + $0x3] ss:$0 sm:$0xff] (!%p141_p3) }
   0x9   : > { %200 = vst.msk [vmem:[#allocation2 + $0x30] sm:$0xff] (!%p141_p3), %vm192_vm0, %v1441_v0  ;;  %201 = vst.msk [vmem:[#allocation2 + $0x38] sm:$0xff] (!%p141_p3), %vm192_vm0, %v1441_v0  ;;  %v1639_v42 = vld [vmem:[%s2518_s1 + $0x4] ss:$0 sm:$0xff] (!%p141_p3)  ;;  %v1646_v46 = vld [vmem:[%s2518_s1 + $0x5] ss:$0 sm:$0xff] (!%p141_p3) }
   0xa   : > { %203 = vst.msk [vmem:[#allocation2 + $0x48] sm:$0xff] (!%p141_p3), %vm192_vm0, %v1441_v0  ;;  %204 = vst.msk [vmem:[#allocation2 + $0x50] sm:$0xff] (!%p141_p3), %vm192_vm0, %v1441_v0  ;;  %v1651_v47 = vld [vmem:[%s2518_s1 + $0x6] ss:$0 sm:$0xff] (!%p141_p3)  ;;  %v1660_v50 = vld [vmem:[%s2518_s1 + $0x7] ss:$0 sm:$0xff] (!%p141_p3) }
   0xb   : > { %206 = vst.msk [vmem:[#allocation2 + $0x60] sm:$0xff] (!%p141_p3), %vm192_vm0, %v1441_v0  ;;  %207 = vst.msk [vmem:[#allocation2 + $0x68] sm:$0xff] (!%p141_p3), %vm192_vm0, %v1441_v0  ;;  %v1673_v60 = vld [vmem:[%s2518_s1 + $0x8] ss:$0 sm:$0xff] (!%p141_p3) }
   0xc   : > { %209 = vst.msk [vmem:[#allocation2 + $0x78] sm:$0xff] (!%p141_p3), %vm192_vm0, %v1441_v0  ;;  %210 = vst.msk [vmem:[#allocation2 + $0x80] sm:$0xff] (!%p141_p3), %vm192_vm0, %v1441_v0 }
   0xd   : > { %212 = vst.msk [vmem:[#allocation2 + $0x90] sm:$0xff] (!%p141_p3), %vm192_vm0, %v1441_v0  ;;  %213 = vst.msk [vmem:[#allocation2 + $0x98] sm:$0xff] (!%p141_p3), %vm192_vm0, %v1441_v0 }
   0xe   : > { %215 = vst.msk [vmem:[#allocation2 + $0xa8] sm:$0xff] %vm192_vm0, %v1441_v0  ;;  %216 = vst.msk [vmem:[#allocation2 + $0xb0] sm:$0xff] %vm192_vm0, %v1441_v0  ;;  %s2525_s9 = smov (!%p172_p4, %s1431_s9), 1  ;;  %v319_v37 = vld [vmem:[#allocation2] sm:$0xff]  ;;  %v320_v51 = vld [vmem:[#allocation2 + $0x8] sm:$0xff] }
   0xf   : > { %218 = vst.msk [vmem:[#allocation2 + $0xc0] sm:$0xff] %vm192_vm0, %v1441_v0  ;;  %219 = vst.msk [vmem:[#allocation2 + $0xc8] sm:$0xff] %vm192_vm0, %v1441_v0  ;;  %s1381_s13 = sshll.u32 %s2525_s9, 8  ;;  %v356_v38 = vmul.f32 %v1593_v22, %v319_v37  ;;  %v420_v39 = vld [vmem:[#allocation2 + $0x2] sm:$0xff]  ;;  %v357_v54 = vmul.f32 %v1593_v22, %v320_v51 }
  0x10   : > { %221 = vst.msk [vmem:[#allocation2 + $0xd8] sm:$0xff] %vm192_vm0, %v1441_v0  ;;  %222 = vst.msk [vmem:[#allocation2 + $0xe0] sm:$0xff] %vm192_vm0, %v1441_v0  ;;  %s1549_s16 = scalar_lea.vmem %s2517_s0, %s1381_s13  ;;  %v521_v40 = vld [vmem:[#allocation2 + $0x4] sm:$0xff]  ;;  %v457_v43 = vmul.f32 %v1604_v26, %v420_v39  ;;  %s1753_s14 = scalar_lea.vmem %s2519_s2, %s1381_s13 }
  0x11   : > { %224 = vst.msk [vmem:[#allocation2 + $0xf0] sm:$0xff] %vm192_vm0, %v1441_v0  ;;  %225 = vst.msk [vmem:[#allocation2 + $0xf8] sm:$0xff] %vm192_vm0, %v1441_v0  ;;  %v254_v1 = vld [vmem:[%s1549_s16] sm:$0xff]  ;;  %v255_v2 = vld [vmem:[%s1549_s16 + $0x8] sm:$0xff]  ;;  %v558_v44 = vmul.f32 %v1609_v27, %v521_v40 }
  0x12   : > { %227 = vst.msk [vmem:[#allocation2 + $0x108] sm:$0xff] %vm192_vm0, %v1441_v0  ;;  %228 = vst.msk [vmem:[#allocation2 + $0x110] sm:$0xff] %vm192_vm0, %v1441_v0  ;;  %v256_v3 = vld [vmem:[%s1549_s16 + $0x10] sm:$0xff]  ;;  %v257_v4 = vld [vmem:[%s1549_s16 + $0x18] sm:$0xff]  ;;  %v489_v52 = vadd.f32 %v457_v43, %v356_v38 }
  0x13   : > { %230 = vst.msk [vmem:[#allocation2 + $0x120] sm:$0xff] %vm192_vm0, %v1441_v0  ;;  %231 = vst.msk [vmem:[#allocation2 + $0x128] sm:$0xff] %vm192_vm0, %v1441_v0  ;;  %v258_v5 = vld [vmem:[%s1549_s16 + $0x20] sm:$0xff]  ;;  %v259_v6 = vld [vmem:[%s1549_s16 + $0x28] sm:$0xff] }
  0x14   : > { %233 = vst.msk [vmem:[#allocation2 + $0x138] sm:$0xff] %vm192_vm0, %v1441_v0  ;;  %234 = vst.msk [vmem:[#allocation2 + $0x140] sm:$0xff] %vm192_vm0, %v1441_v0  ;;  %v260_v7 = vld [vmem:[%s1549_s16 + $0x30] sm:$0xff]  ;;  %v261_v8 = vld [vmem:[%s1549_s16 + $0x38] sm:$0xff] }
  0x15   : > { %236 = vst.msk [vmem:[#allocation2 + $0x150] sm:$0xff] %vm192_vm0, %v1441_v0  ;;  %237 = vst.msk [vmem:[#allocation2 + $0x158] sm:$0xff] %vm192_vm0, %v1441_v0  ;;  %v262_v9 = vld [vmem:[%s1549_s16 + $0x40] sm:$0xff]  ;;  %v263_v10 = vld [vmem:[%s1549_s16 + $0x48] sm:$0xff] }
  0x16   : > { %239 = vst.msk [vmem:[#allocation2 + $0x168] sm:$0xff] %vm192_vm0, %v1441_v0  ;;  %240 = vst.msk [vmem:[#allocation2 + $0x170] sm:$0xff] %vm192_vm0, %v1441_v0  ;;  %v264_v11 = vld [vmem:[%s1549_s16 + $0x50] sm:$0xff]  ;;  %v265_v12 = vld [vmem:[%s1549_s16 + $0x58] sm:$0xff] }
  0x17   : > { %242 = vst.msk [vmem:[#allocation2 + $0x180] sm:$0xff] %vm192_vm0, %v1441_v0  ;;  %243 = vst.msk [vmem:[#allocation2 + $0x188] sm:$0xff] %vm192_vm0, %v1441_v0  ;;  %v266_v13 = vld [vmem:[%s1549_s16 + $0x60] sm:$0xff]  ;;  %v267_v14 = vld [vmem:[%s1549_s16 + $0x68] sm:$0xff] }
  0x18   : > { %245 = vst.msk [vmem:[#allocation2 + $0x198] sm:$0xff] %vm192_vm0, %v1441_v0  ;;  %246 = vst.msk [vmem:[#allocation2 + $0x1a0] sm:$0xff] %vm192_vm0, %v1441_v0  ;;  %v268_v15 = vld [vmem:[%s1549_s16 + $0x70] sm:$0xff]  ;;  %v269_v16 = vld [vmem:[%s1549_s16 + $0x78] sm:$0xff] }
  0x19   : > { %248 = vst.msk [vmem:[#allocation2 + $0x1b0] sm:$0xff] %vm192_vm0, %v1441_v0  ;;  %249 = vst.msk [vmem:[#allocation2 + $0x1b8] sm:$0xff] %vm192_vm0, %v1441_v0  ;;  %v270_v17 = vld [vmem:[%s1549_s16 + $0x80] sm:$0xff]  ;;  %v271_v18 = vld [vmem:[%s1549_s16 + $0x88] sm:$0xff] }
  0x1a   : > { %251 = vst.msk [vmem:[#allocation2 + $0x1c8] sm:$0xff] %vm192_vm0, %v1441_v0  ;;  %252 = vst.msk [vmem:[#allocation2 + $0x1d0] sm:$0xff] %vm192_vm0, %v1441_v0  ;;  %v272_v19 = vld [vmem:[%s1549_s16 + $0x90] sm:$0xff]  ;;  %v273_v20 = vld [vmem:[%s1549_s16 + $0x98] sm:$0xff] }
  0x1b   : > { %196 = vst.msk [vmem:[#allocation2 + $0x10] sm:$0xf] %vm195_vm1, %v1441_v0  ;;  %199 = vst.msk [vmem:[#allocation2 + $0x28] sm:$0xf] %vm195_vm1, %v1441_v0  ;;  %v274_v21 = vld [vmem:[%s1549_s16 + $0xa0] sm:$0xff]  ;;  %v275_v23 = vld [vmem:[%s1549_s16 + $0xa8] sm:$0xff] }
  0x1c   : > { %202 = vst.msk [vmem:[#allocation2 + $0x40] sm:$0xf] %vm195_vm1, %v1441_v0  ;;  %205 = vst.msk [vmem:[#allocation2 + $0x58] sm:$0xf] %vm195_vm1, %v1441_v0  ;;  %v276_v24 = vld [vmem:[%s1549_s16 + $0xb0] sm:$0xff]  ;;  %v277_v25 = vld [vmem:[%s1549_s16 + $0xb8] sm:$0xff] }
  0x1d   : > { %208 = vst.msk [vmem:[#allocation2 + $0x70] sm:$0xf] %vm195_vm1, %v1441_v0  ;;  %211 = vst.msk [vmem:[#allocation2 + $0x88] sm:$0xf] %vm195_vm1, %v1441_v0  ;;  %v278_v28 = vld [vmem:[%s1549_s16 + $0xc0] sm:$0xff]  ;;  %v279_v29 = vld [vmem:[%s1549_s16 + $0xc8] sm:$0xff] }
  0x1e   : > { %214 = vst.msk [vmem:[#allocation2 + $0xa0] sm:$0xf] %vm195_vm1, %v1441_v0  ;;  %217 = vst.msk [vmem:[#allocation2 + $0xb8] sm:$0xf] %vm195_vm1, %v1441_v0  ;;  %v280_v30 = vld [vmem:[%s1549_s16 + $0xd0] sm:$0xff]  ;;  %v281_v31 = vld [vmem:[%s1549_s16 + $0xd8] sm:$0xff] }
  0x1f   : > { %220 = vst.msk [vmem:[#allocation2 + $0xd0] sm:$0xf] %vm195_vm1, %v1441_v0  ;;  %223 = vst.msk [vmem:[#allocation2 + $0xe8] sm:$0xf] %vm195_vm1, %v1441_v0  ;;  %v282_v32 = vld [vmem:[%s1549_s16 + $0xe0] sm:$0xff]  ;;  %v283_v33 = vld [vmem:[%s1549_s16 + $0xe8] sm:$0xff] }
  0x20   : > { %226 = vst.msk [vmem:[#allocation2 + $0x100] sm:$0xf] %vm195_vm1, %v1441_v0  ;;  %229 = vst.msk [vmem:[#allocation2 + $0x118] sm:$0xf] %vm195_vm1, %v1441_v0  ;;  %v284_v35 = vld [vmem:[%s1549_s16 + $0xf0] sm:$0xff]  ;;  %v285_v36 = vld [vmem:[%s1549_s16 + $0xf8] sm:$0xff] }
  0x21   : > { %232 = vst.msk [vmem:[#allocation2 + $0x130] sm:$0xf] %vm195_vm1, %v1441_v0  ;;  %235 = vst.msk [vmem:[#allocation2 + $0x148] sm:$0xf] %vm195_vm1, %v1441_v0 }
  0x22   : > { %238 = vst.msk [vmem:[#allocation2 + $0x160] sm:$0xf] %vm195_vm1, %v1441_v0  ;;  %241 = vst.msk [vmem:[#allocation2 + $0x178] sm:$0xf] %vm195_vm1, %v1441_v0  ;;  %v421_v55 = vld [vmem:[#allocation2 + $0xa] sm:$0xff] }
  0x23   : > { %244 = vst.msk [vmem:[#allocation2 + $0x190] sm:$0xf] %vm195_vm1, %v1441_v0  ;;  %247 = vst.msk [vmem:[#allocation2 + $0x1a8] sm:$0xf] %vm195_vm1, %v1441_v0  ;;  %v522_v56 = vld [vmem:[#allocation2 + $0xc] sm:$0xff]  ;;  %v458_v61 = vmul.f32 %v1604_v26, %v421_v55 }
  0x24   : > { %250 = vst.msk [vmem:[#allocation2 + $0x1c0] sm:$0xf] %vm195_vm1, %v1441_v0  ;;  %253 = vst.msk [vmem:[#allocation2 + $0x1d8] sm:$0xf] %vm195_vm1, %v1441_v0  ;;  %v559_v62 = vmul.f32 %v1609_v27, %v522_v56 }
  0x25   : > { %287 = vst.msk [vmem:[#allocation2 + $0x32] sm:$0xff] %vm192_vm0, %v254_v1  ;;  %288 = vst.msk [vmem:[#allocation2 + $0x3a] sm:$0xff] %vm192_vm0, %v255_v2  ;;  %v590_v1 = vadd.f32 %v558_v44, %v489_v52 }
  0x26   : > { %289 = vst.msk [vmem:[#allocation2 + $0x4a] sm:$0xff] %vm192_vm0, %v256_v3  ;;  %290 = vst.msk [vmem:[#allocation2 + $0x52] sm:$0xff] %vm192_vm0, %v257_v4 }
  0x27   : > { %291 = vst.msk [vmem:[#allocation2 + $0x62] sm:$0xff] %vm192_vm0, %v258_v5  ;;  %292 = vst.msk [vmem:[#allocation2 + $0x6a] sm:$0xff] %vm192_vm0, %v259_v6  ;;  %v321_v6 = vld [vmem:[#allocation2 + $0x18] sm:$0xff] }
  0x28   : > { %293 = vst.msk [vmem:[#allocation2 + $0x7a] sm:$0xff] %vm192_vm0, %v260_v7  ;;  %294 = vst.msk [vmem:[#allocation2 + $0x82] sm:$0xff] %vm192_vm0, %v261_v8  ;;  %v490_v8 = vadd.f32 %v458_v61, %v357_v54 }
  0x29   : > { %295 = vst.msk [vmem:[#allocation2 + $0x92] sm:$0xff] %vm192_vm0, %v262_v9  ;;  %296 = vst.msk [vmem:[#allocation2 + $0x9a] sm:$0xff] %vm192_vm0, %v263_v10  ;;  %v358_v10 = vmul.f32 %v1593_v22, %v321_v6 }
  0x2a   : > { %297 = vst.msk [vmem:[#allocation2 + $0xaa] sm:$0xff] %vm192_vm0, %v264_v11  ;;  %298 = vst.msk [vmem:[#allocation2 + $0xb2] sm:$0xff] %vm192_vm0, %v265_v12  ;;  %v422_v11 = vld [vmem:[#allocation2 + $0x1a] sm:$0xff] }
  0x2b   : > { %299 = vst.msk [vmem:[#allocation2 + $0xc2] sm:$0xff] %vm192_vm0, %v266_v13  ;;  %300 = vst.msk [vmem:[#allocation2 + $0xca] sm:$0xff] %vm192_vm0, %v267_v14  ;;  %v523_v12 = vld [vmem:[#allocation2 + $0x1c] sm:$0xff] }
  0x2c   : > { %301 = vst.msk [vmem:[#allocation2 + $0xda] sm:$0xff] %vm192_vm0, %v268_v15  ;;  %302 = vst.msk [vmem:[#allocation2 + $0xe2] sm:$0xff] %vm192_vm0, %v269_v16  ;;  %v622_v41 = vld [vmem:[#allocation2 + $0x30] sm:$0xff]  ;;  %v1664_v57 = vld [vmem:[#allocation2 + $0x38] sm:$0xff] }
  0x2d   : > { %303 = vst.msk [vmem:[#allocation2 + $0xf2] sm:$0xff] %vm192_vm0, %v270_v17  ;;  %304 = vst.msk [vmem:[#allocation2 + $0xfa] sm:$0xff] %vm192_vm0, %v271_v18  ;;  %v723_v45 = vld [vmem:[#allocation2 + $0x32] sm:$0xff]  ;;  %v659_v53 = vmul.f32 %v1626_v34, %v622_v41  ;;  %v360_v63 = vmul.f32 %v1593_v22, %v622_v41  ;;  %v1682_v4 = vld [vmem:[#allocation2 + $0x3a] sm:$0xff]  ;;  %v660_v9 = vmul.f32 %v1626_v34, %v1664_v57 }
  0x2e   : > { %305 = vst.msk [vmem:[#allocation2 + $0x10a] sm:$0xff] %vm192_vm0, %v272_v19  ;;  %306 = vst.msk [vmem:[#allocation2 + $0x112] sm:$0xff] %vm192_vm0, %v273_v20  ;;  %v1653_v48 = vld [vmem:[#allocation2 + $0x34] sm:$0xff]  ;;  %v1655_v49 = vld [vmem:[#allocation2 + $0x60] sm:$0xff]  ;;  %v461_v0 = vmul.f32 %v1604_v26, %v723_v45  ;;  %v760_v2 = vmul.f32 %v1639_v42, %v723_v45  ;;  %v459_v17 = vmul.f32 %v1604_v26, %v422_v11 }
  0x2f   : > { %307 = vst.msk [vmem:[#allocation2 + $0x122] sm:$0xff] %vm192_vm0, %v274_v21  ;;  %308 = vst.msk [vmem:[#allocation2 + $0x12a] sm:$0xff] %vm192_vm0, %v275_v23  ;;  %v1666_v58 = vld [vmem:[#allocation2 + $0x62] sm:$0xff]  ;;  %v861_v3 = vmul.f32 %v1646_v46, %v1653_v48  ;;  %v963_v7 = vmul.f32 %v1651_v47, %v1655_v49  ;;  %v691_v14 = vadd.f32 %v659_v53, %v590_v1  ;;  %v1703_v23 = vld [vmem:[#allocation2 + $0x6a] sm:$0xff] }
  0x30   : > { %309 = vst.msk [vmem:[#allocation2 + $0x13a] sm:$0xff] %vm192_vm0, %v276_v24  ;;  %310 = vst.msk [vmem:[#allocation2 + $0x142] sm:$0xff] %vm192_vm0, %v277_v25  ;;  %v1668_v59 = vld [vmem:[#allocation2 + $0x64] sm:$0xff]  ;;  %v1684_v5 = vld [vmem:[#allocation2 + $0x3c] sm:$0xff]  ;;  %v1064_v15 = vmul.f32 %v1660_v50, %v1666_v58  ;;  %v560_v18 = vmul.f32 %v1609_v27, %v523_v12  ;;  %v591_v20 = vadd.f32 %v559_v62, %v490_v8 }
  0x31   : > { %311 = vst.msk [vmem:[#allocation2 + $0x152] sm:$0xff] %vm192_vm0, %v278_v28  ;;  %312 = vst.msk [vmem:[#allocation2 + $0x15a] sm:$0xff] %vm192_vm0, %v279_v29  ;;  %v1691_v13 = vld [vmem:[#allocation2 + $0x48] sm:$0xff]  ;;  %v1165_v19 = vmul.f32 %v1673_v60, %v1668_v59  ;;  %v761_v21 = vmul.f32 %v1639_v42, %v1682_v4  ;;  %v322_v25 = vld [vmem:[#allocation2 + $0x20] sm:$0xff]  ;;  %v493_v28 = vadd.f32 %v461_v0, %v360_v63 }
  0x32   : > { %313 = vst.msk [vmem:[#allocation2 + $0x16a] sm:$0xff] %vm192_vm0, %v280_v30  ;;  %314 = vst.msk [vmem:[#allocation2 + $0x172] sm:$0xff] %vm192_vm0, %v281_v31  ;;  %v1695_v16 = vld [vmem:[#allocation2 + $0x68] sm:$0xff]  ;;  %v792_v29 = vadd.f32 %v760_v2, %v691_v14  ;;  %v862_v30 = vmul.f32 %v1646_v46, %v1684_v5  ;;  %v491_v31 = vadd.f32 %v459_v17, %v358_v10  ;;  %v1724_v53 = vld [vmem:[#allocation2 + $0x78] sm:$0xff] }
  0x33   : > { %315 = vst.msk [vmem:[#allocation2 + $0x182] sm:$0xff] %vm192_vm0, %v282_v32  ;;  %316 = vst.msk [vmem:[#allocation2 + $0x18a] sm:$0xff] %vm192_vm0, %v283_v33  ;;  %v1705_v24 = vld [vmem:[#allocation2 + $0x6c] sm:$0xff]  ;;  %v661_v32 = vmul.f32 %v1626_v34, %v1691_v13  ;;  %v423_v33 = vld [vmem:[#allocation2 + $0x22] sm:$0xff]  ;;  %v692_v37 = vadd.f32 %v660_v9, %v591_v20  ;;  %v359_v40 = vmul.f32 %v1593_v22, %v322_v25 }
  0x34   : > { %317 = vst.msk [vmem:[#allocation2 + $0x19a] sm:$0xff] %vm192_vm0, %v284_v35  ;;  %318 = vst.msk [vmem:[#allocation2 + $0x1a2] sm:$0xff] %vm192_vm0, %v285_v36  ;;  %v524_v35 = vld [vmem:[#allocation2 + $0x24] sm:$0xff]  ;;  %v1711_v36 = vld [vmem:[#allocation2 + $0x50] sm:$0xff]  ;;  %v460_v41 = vmul.f32 %v1604_v26, %v423_v33  ;;  %v893_v44 = vadd.f32 %v861_v3, %v792_v29  ;;  %v964_v45 = vmul.f32 %v1651_v47, %v1695_v16 }
  0x35   : > { %v1713_v38 = vld [vmem:[#allocation2 + $0x4a] sm:$0xff]  ;;  %v561_v43 = vmul.f32 %v1609_v27, %v524_v35  ;;  %v1065_v51 = vmul.f32 %v1660_v50, %v1703_v23  ;;  %v592_v52 = vadd.f32 %v560_v18, %v491_v31  ;;  %v793_v54 = vadd.f32 %v761_v21, %v692_v37  ;;  %v1728_v56 = vld [vmem:[#allocation2 + $0x7a] sm:$0xff]  ;;  %v1732_v63 = vld [vmem:[#allocation2 + $0x52] sm:$0xff] }
  0x36   : > { %v1715_v39 = vld [vmem:[#allocation2 + $0x4c] sm:$0xff]  ;;  %v1166_v55 = vmul.f32 %v1673_v60, %v1705_v24  ;;  %v492_v61 = vadd.f32 %v460_v41, %v359_v40  ;;  %v662_v62 = vmul.f32 %v1626_v34, %v1711_v36  ;;  %v995_v0 = vadd.f32 %v963_v7, %v893_v44  ;;  %v1740_v10 = vld [vmem:[#allocation2 + $0x54] sm:$0xff]  ;;  %v1755_v20 = vld [vmem:[#allocation2 + $0x7c] sm:$0xff] }
  0x37   : > { %v693_v1 = vadd.f32 %v661_v32, %v592_v52  ;;  %v762_v2 = vmul.f32 %v1639_v42, %v1713_v38  ;;  %v863_v3 = vmul.f32 %v1646_v46, %v1715_v39  ;;  %v894_v6 = vadd.f32 %v862_v30, %v793_v54  ;;  %v1765_v37 = vld [vmem:[#allocation2 + $0x82] sm:$0xff]  ;;  %v1775_v44 = vld [vmem:[#allocation2 + $0x90] sm:$0xff] }
  0x38   : > { %v965_v8 = vmul.f32 %v1651_v47, %v1724_v53  ;;  %v593_v9 = vadd.f32 %v561_v43, %v492_v61  ;;  %v562_v11 = vmul.f32 %v1609_v27, %v1653_v48  ;;  %v1096_v12 = vadd.f32 %v1064_v15, %v995_v0  ;;  %v1757_v48 = vld [vmem:[#allocation2 + $0x80] sm:$0xff] }
  0x39   : > { %v794_v14 = vadd.f32 %v762_v2, %v693_v1  ;;  %v1066_v7 = vmul.f32 %v1660_v50, %v1728_v56  ;;  %v763_v17 = vmul.f32 %v1639_v42, %v1732_v63  ;;  %v996_v18 = vadd.f32 %v964_v45, %v894_v6  ;;  %v1783_v0 = vld [vmem:[#allocation2 + $0x84] sm:$0xff]  ;;  %v1785_v1 = vld [vmem:[#allocation2 + $0x92] sm:$0xff] }
  0x3a   : > { %v694_v21 = vadd.f32 %v662_v62, %v593_v9  ;;  %v594_v15 = vadd.f32 %v562_v11, %v493_v28  ;;  %v663_v25 = vmul.f32 %v1626_v34, %v1655_v49  ;;  %v1197_v29 = vadd.f32 %v1165_v19, %v1096_v12  ;;  %v1795_v11 = vld [vmem:[#allocation2 + $0x94] sm:$0xff] }
  0x3b   : > { %v895_v30 = vadd.f32 %v863_v3, %v794_v14  ;;  %v864_v31 = vmul.f32 %v1646_v46, %v1740_v10  ;;  %v764_v32 = vmul.f32 %v1639_v42, %v1666_v58  ;;  %v1097_v33 = vadd.f32 %v1065_v51, %v996_v18 }
  0x3c   : > { %v795_v35 = vadd.f32 %v763_v17, %v694_v21  ;;  %v695_v40 = vadd.f32 %v663_v25, %v594_v15  ;;  %v361_v41 = vmul.f32 %v1593_v22, %v1664_v57  ;;  %1229 = vst.msk [vmem:[%s1753_s14] sm:$0xff] %vm192_vm0, %v1197_v29  ;;  %v1167_v19 = vmul.f32 %v1673_v60, %v1755_v20  ;;  %v1809_v29 = vld [vmem:[#allocation2 + $0x98] sm:$0xff] }
  0x3d   : > { %v997_v28 = vadd.f32 %v965_v8, %v895_v30  ;;  %v966_v43 = vmul.f32 %v1651_v47, %v1757_v48  ;;  %v462_v45 = vmul.f32 %v1604_v26, %v1682_v4  ;;  %v1198_v51 = vadd.f32 %v1166_v55, %v1097_v33 }
  0x3e   : > { %v896_v52 = vadd.f32 %v864_v31, %v795_v35  ;;  %v796_v54 = vadd.f32 %v764_v32, %v695_v40  ;;  %v865_v57 = vmul.f32 %v1646_v46, %v1668_v59  ;;  %v1067_v62 = vmul.f32 %v1660_v50, %v1765_v37  ;;  %v1819_v40 = vld [vmem:[#allocation2 + $0x9c] sm:$0xff] }
  0x3f   : > { %v1098_v61 = vadd.f32 %v1066_v7, %v997_v28  ;;  %v494_v2 = vadd.f32 %v462_v45, %v361_v41  ;;  %v563_v3 = vmul.f32 %v1609_v27, %v1684_v5  ;;  %1230 = vst.msk [vmem:[%s1753_s14 + $0x8] sm:$0xff] %vm192_vm0, %v1198_v51  ;;  %v967_v6 = vmul.f32 %v1651_v47, %v1775_v44 }
  0x40   : > { %v998_v4 = vadd.f32 %v966_v43, %v896_v52  ;;  %v897_v55 = vadd.f32 %v865_v57, %v796_v54  ;;  %v664_v8 = vmul.f32 %v1626_v34, %v1695_v16  ;;  %v362_v14 = vmul.f32 %v1593_v22, %v1691_v13  ;;  %v1811_v13 = vld [vmem:[#allocation2 + $0x9a] sm:$0xff]  ;;  %v1823_v43 = vld [vmem:[#allocation2 + $0xa8] sm:$0xff] }
  0x41   : > { %v1199_v9 = vadd.f32 %v1167_v19, %v1098_v61  ;;  %v595_v12 = vadd.f32 %v563_v3, %v494_v2  ;;  %v463_v5 = vmul.f32 %v1604_v26, %v1713_v38  ;;  %v1168_v17 = vmul.f32 %v1673_v60, %v1783_v0  ;;  %v1839_v2 = vld [vmem:[#allocation2 + $0xaa] sm:$0xff] }
  0x42   : > { %v1099_v7 = vadd.f32 %v1067_v62, %v998_v4  ;;  %v999_v18 = vadd.f32 %v967_v6, %v897_v55  ;;  %v1068_v21 = vmul.f32 %v1660_v50, %v1785_v1  ;;  %v765_v25 = vmul.f32 %v1639_v42, %v1703_v23  ;;  %v1841_v3 = vld [vmem:[#allocation2 + $0xac] sm:$0xff] }
  0x43   : > { %1231 = vst.msk [vmem:[%s1753_s14 + $0x10] sm:$0xff] %vm192_vm0, %v1199_v9  ;;  %v696_v15 = vadd.f32 %v664_v8, %v595_v12  ;;  %v495_v38 = vadd.f32 %v463_v5, %v362_v14  ;;  %v564_v30 = vmul.f32 %v1609_v27, %v1715_v39  ;;  %v1169_v33 = vmul.f32 %v1673_v60, %v1795_v11 }
  0x44   : > { %v1200_v31 = vadd.f32 %v1168_v17, %v1099_v7  ;;  %v1100_v32 = vadd.f32 %v1068_v21, %v999_v18  ;;  %v866_v35 = vmul.f32 %v1646_v46, %v1705_v24  ;;  %v665_v19 = vmul.f32 %v1626_v34, %v1724_v53 }
  0x45   : > { %v797_v41 = vadd.f32 %v765_v25, %v696_v15  ;;  %v596_v28 = vadd.f32 %v564_v30, %v495_v38  ;;  %v363_v39 = vmul.f32 %v1593_v22, %v1711_v36  ;;  %v968_v51 = vmul.f32 %v1651_v47, %v1809_v29  ;;  %v1861_v15 = vld [vmem:[#allocation2 + $0xb0] sm:$0xff] }
  0x46   : > { %1232 = vst.msk [vmem:[%s1753_s14 + $0x18] sm:$0xff] %vm192_vm0, %v1200_v31  ;;  %v1201_v45 = vadd.f32 %v1169_v33, %v1100_v32  ;;  %v1069_v52 = vmul.f32 %v1660_v50, %v1811_v13  ;;  %v464_v54 = vmul.f32 %v1604_v26, %v1732_v63  ;;  %v1170_v61 = vmul.f32 %v1673_v60, %v1819_v40  ;;  %v1863_v25 = vld [vmem:[#allocation2 + $0xb2] sm:$0xff] }
  0x47   : > { %v898_v57 = vadd.f32 %v866_v35, %v797_v41  ;;  %v697_v62 = vadd.f32 %v665_v19, %v596_v28  ;;  %v766_v36 = vmul.f32 %v1639_v42, %v1728_v56  ;;  %v867_v4 = vmul.f32 %v1646_v46, %v1755_v20  ;;  %v1871_v32 = vld [vmem:[#allocation2 + $0xb4] sm:$0xff] }
  0x48   : > { %1233 = vst.msk [vmem:[%s1753_s14 + $0x20] sm:$0xff] %vm192_vm0, %v1201_v45  ;;  %v969_v63 = vmul.f32 %v1651_v47, %v1823_v43  ;;  %v496_v55 = vadd.f32 %v464_v54, %v363_v39  ;;  %v565_v6 = vmul.f32 %v1609_v27, %v1740_v10  ;;  %v364_v12 = vmul.f32 %v1593_v22, %v1655_v49 }
  0x49   : > { %v1000_v8 = vadd.f32 %v968_v51, %v898_v57  ;;  %v798_v9 = vadd.f32 %v766_v36, %v697_v62  ;;  %v465_v14 = vmul.f32 %v1604_v26, %v1666_v58  ;;  %v1070_v5 = vmul.f32 %v1660_v50, %v1839_v2  ;;  %v1881_v51 = vld [vmem:[#allocation2 + $0xc0] sm:$0xff] }
  0x4a   : > { %v1171_v7 = vmul.f32 %v1673_v60, %v1841_v3  ;;  %v597_v17 = vadd.f32 %v565_v6, %v496_v55  ;;  %v666_v18 = vmul.f32 %v1626_v34, %v1757_v48  ;;  %v566_v58 = vmul.f32 %v1609_v27, %v1668_v59 }
  0x4b   : > { %v1101_v21 = vadd.f32 %v1069_v52, %v1000_v8  ;;  %v899_v10 = vadd.f32 %v867_v4, %v798_v9  ;;  %v497_v49 = vadd.f32 %v465_v14, %v364_v12  ;;  %v767_v30 = vmul.f32 %v1639_v42, %v1765_v37  ;;  %v1893_v4 = vld [vmem:[#allocation2 + $0xc2] sm:$0xff] }
  0x4c   : > { %v698_v38 = vadd.f32 %v666_v18, %v597_v17  ;;  %v868_v31 = vmul.f32 %v1646_v46, %v1783_v0  ;;  %v667_v33 = vmul.f32 %v1626_v34, %v1775_v44  ;;  %v365_v19 = vmul.f32 %v1593_v22, %v1695_v16 }
  0x4d   : > { %v1202_v35 = vadd.f32 %v1170_v61, %v1101_v21  ;;  %v1001_v41 = vadd.f32 %v969_v63, %v899_v10  ;;  %v598_v28 = vadd.f32 %v566_v58, %v497_v49  ;;  %v970_v59 = vmul.f32 %v1651_v47, %v1861_v15  ;;  %v1895_v63 = vld [vmem:[#allocation2 + $0xc4] sm:$0xff] }
  0x4e   : > { %v799_v39 = vadd.f32 %v767_v30, %v698_v38  ;;  %v1071_v45 = vmul.f32 %v1660_v50, %v1863_v25  ;;  %v466_v52 = vmul.f32 %v1604_v26, %v1703_v23  ;;  %v1172_v57 = vmul.f32 %v1673_v60, %v1871_v32  ;;  %v1915_v58 = vld [vmem:[#allocation2 + $0xc8] sm:$0xff] }
  0x4f   : > { %1234 = vst.msk [vmem:[%s1753_s14 + $0x28] sm:$0xff] %vm192_vm0, %v1202_v35  ;;  %v1102_v54 = vadd.f32 %v1070_v5, %v1001_v41  ;;  %v699_v61 = vadd.f32 %v667_v33, %v598_v28  ;;  %v768_v16 = vmul.f32 %v1639_v42, %v1785_v1  ;;  %v869_v36 = vmul.f32 %v1646_v46, %v1795_v11  ;;  %v1917_v38 = vld [vmem:[#allocation2 + $0xca] sm:$0xff] }
  0x50   : > { %v900_v62 = vadd.f32 %v868_v31, %v799_v39  ;;  %v498_v23 = vadd.f32 %v466_v52, %v365_v19  ;;  %v567_v55 = vmul.f32 %v1609_v27, %v1705_v24  ;;  %v971_v9 = vmul.f32 %v1651_v47, %v1881_v51  ;;  %v1927_v39 = vld [vmem:[#allocation2 + $0xcc] sm:$0xff] }
  0x51   : > { %v1203_v6 = vadd.f32 %v1171_v7, %v1102_v54  ;;  %v800_v8 = vadd.f32 %v768_v16, %v699_v61  ;;  %v366_v12 = vmul.f32 %v1593_v22, %v1724_v53  ;;  %v668_v17 = vmul.f32 %v1626_v34, %v1809_v29  ;;  %v1939_v16 = vld [vmem:[#allocation2 + $0xd8] sm:$0xff] }
  0x52   : > { %v1002_v14 = vadd.f32 %v970_v59, %v900_v62  ;;  %v599_v5 = vadd.f32 %v567_v55, %v498_v23  ;;  %v467_v18 = vmul.f32 %v1604_v26, %v1728_v56  ;;  %v1072_v24 = vmul.f32 %v1660_v50, %v1893_v4  ;;  %v1941_v62 = vld [vmem:[#allocation2 + $0xda] sm:$0xff] }
  0x53   : > { %1235 = vst.msk [vmem:[%s1753_s14 + $0x30] sm:$0xff] %vm192_vm0, %v1203_v6  ;;  %v901_v21 = vadd.f32 %v869_v36, %v800_v8  ;;  %v1173_v7 = vmul.f32 %v1673_v60, %v1895_v63  ;;  %v769_v53 = vmul.f32 %v1639_v42, %v1811_v13  ;;  %v568_v30 = vmul.f32 %v1609_v27, %v1755_v20 }
  0x54   : > { %v1103_v10 = vadd.f32 %v1071_v45, %v1002_v14  ;;  %v700_v49 = vadd.f32 %v668_v17, %v599_v5  ;;  %v499_v56 = vadd.f32 %v467_v18, %v366_v12  ;;  %v870_v33 = vmul.f32 %v1646_v46, %v1819_v40  ;;  %v1953_v17 = vld [vmem:[#allocation2 + $0xe0] sm:$0xff] }
  0x55   : > { %v1003_v31 = vadd.f32 %v971_v9, %v901_v21  ;;  %v669_v35 = vmul.f32 %v1626_v34, %v1823_v43  ;;  %v367_v41 = vmul.f32 %v1593_v22, %v1757_v48  ;;  %v468_v45 = vmul.f32 %v1604_v26, %v1765_v37  ;;  %v1943_v37 = vld [vmem:[#allocation2 + $0xdc] sm:$0xff] }
  0x56   : > { %v1204_v28 = vadd.f32 %v1172_v57, %v1103_v10  ;;  %v801_v19 = vadd.f32 %v769_v53, %v700_v49  ;;  %v600_v59 = vadd.f32 %v568_v30, %v499_v56  ;;  %v972_v20 = vmul.f32 %v1651_v47, %v1915_v58  ;;  %v1969_v56 = vld [vmem:[#allocation2 + $0xe2] sm:$0xff] }
  0x57   : > { %v1104_v52 = vadd.f32 %v1072_v24, %v1003_v31  ;;  %v1073_v54 = vmul.f32 %v1660_v50, %v1917_v38  ;;  %v770_v61 = vmul.f32 %v1639_v42, %v1839_v2  ;;  %v500_v36 = vadd.f32 %v468_v45, %v367_v41 }
  0x58   : > { %1236 = vst.msk [vmem:[%s1753_s14 + $0x38] sm:$0xff] %vm192_vm0, %v1204_v28  ;;  %v902_v48 = vadd.f32 %v870_v33, %v801_v19  ;;  %v701_v57 = vadd.f32 %v669_v35, %v600_v59  ;;  %v569_v23 = vmul.f32 %v1609_v27, %v1783_v0  ;;  %v1174_v6 = vmul.f32 %v1673_v60, %v1927_v39  ;;  %v1975_v33 = vld [vmem:[#allocation2 + $0xe4] sm:$0xff] }
  0x59   : > { %v1205_v55 = vadd.f32 %v1173_v7, %v1104_v52  ;;  %v871_v8 = vmul.f32 %v1646_v46, %v1841_v3  ;;  %v670_v9 = vmul.f32 %v1626_v34, %v1861_v15  ;;  %v368_v18 = vmul.f32 %v1593_v22, %v1775_v44 }
  0x5a   : > { %v1004_v12 = vadd.f32 %v972_v20, %v902_v48  ;;  %v802_v14 = vadd.f32 %v770_v61, %v701_v57  ;;  %v601_v5 = vadd.f32 %v569_v23, %v500_v36  ;;  %v973_v0 = vmul.f32 %v1651_v47, %v1939_v16 }
  0x5b   : > { %1237 = vst.msk [vmem:[%s1753_s14 + $0x40] sm:$0xff] %vm192_vm0, %v1205_v55  ;;  %v1074_v21 = vmul.f32 %v1660_v50, %v1941_v62  ;;  %v1175_v24 = vmul.f32 %v1673_v60, %v1943_v37  ;;  %v469_v7 = vmul.f32 %v1604_v26, %v1785_v1  ;;  %v771_v44 = vmul.f32 %v1639_v42, %v1863_v25  ;;  %v1997_v55 = vld [vmem:[#allocation2 + $0xf2] sm:$0xff] }
  0x5c   : > { %v1105_v53 = vadd.f32 %v1073_v54, %v1004_v12  ;;  %v903_v10 = vadd.f32 %v871_v8, %v802_v14  ;;  %v702_v49 = vadd.f32 %v670_v9, %v601_v5  ;;  %v872_v30 = vmul.f32 %v1646_v46, %v1871_v32  ;;  %v1985_v54 = vld [vmem:[#allocation2 + $0xf0] sm:$0xff] }
  0x5d   : > { %v974_v31 = vmul.f32 %v1651_v47, %v1953_v17  ;;  %v501_v35 = vadd.f32 %v469_v7, %v368_v18  ;;  %v570_v1 = vmul.f32 %v1609_v27, %v1795_v11  ;;  %v369_v59 = vmul.f32 %v1593_v22, %v1809_v29 }
  0x5e   : > { %v1206_v41 = vadd.f32 %v1174_v6, %v1105_v53  ;;  %v1005_v28 = vadd.f32 %v973_v0, %v903_v10  ;;  %v803_v19 = vadd.f32 %v771_v44, %v702_v49  ;;  %v1075_v45 = vmul.f32 %v1660_v50, %v1969_v56  ;;  %v1999_v6 = vld [vmem:[#allocation2 + $0xf4] sm:$0xff] }
  0x5f   : > { %v602_v52 = vadd.f32 %v570_v1, %v501_v35  ;;  %v671_v20 = vmul.f32 %v1626_v34, %v1881_v51  ;;  %v470_v61 = vmul.f32 %v1604_v26, %v1811_v13  ;;  %v1176_v57 = vmul.f32 %v1673_v60, %v1975_v33  ;;  %v2019_v44 = vld [vmem:[#allocation2 + $0xf8] sm:$0xff] }
  0x60   : > { %1238 = vst.msk [vmem:[%s1753_s14 + $0x48] sm:$0xff] %vm192_vm0, %v1206_v41  ;;  %v1106_v11 = vadd.f32 %v1074_v21, %v1005_v28  ;;  %v904_v48 = vadd.f32 %v872_v30, %v803_v19  ;;  %v772_v29 = vmul.f32 %v1639_v42, %v1893_v4  ;;  %v873_v23 = vmul.f32 %v1646_v46, %v1895_v63  ;;  %v2021_v30 = vld [vmem:[#allocation2 + $0xfa] sm:$0xff] }
  0x61   : > { %v703_v36 = vadd.f32 %v671_v20, %v602_v52  ;;  %v502_v13 = vadd.f32 %v470_v61, %v369_v59  ;;  %v571_v8 = vmul.f32 %v1609_v27, %v1819_v40  ;;  %v975_v14 = vmul.f32 %v1651_v47, %v1985_v54 }
  0x62   : > { %v1207_v9 = vadd.f32 %v1175_v24, %v1106_v11  ;;  %v1006_v12 = vadd.f32 %v974_v31, %v904_v48  ;;  %v370_v5 = vmul.f32 %v1593_v22, %v1823_v43  ;;  %v672_v21 = vmul.f32 %v1626_v34, %v1915_v58 }
  0x63   : > { %v804_v18 = vadd.f32 %v772_v29, %v703_v36  ;;  %v603_v0 = vadd.f32 %v571_v8, %v502_v13  ;;  %v471_v7 = vmul.f32 %v1604_v26, %v1839_v2  ;;  %v1076_v40 = vmul.f32 %v1660_v50, %v1997_v55  ;;  %v2045_v36 = vld [vmem:[#allocation2 + $0x108] sm:$0xff] }
  0x64   : > { %1239 = vst.msk [vmem:[%s1753_s14 + $0x50] sm:$0xff] %vm192_vm0, %v1207_v9  ;;  %v1107_v53 = vadd.f32 %v1075_v45, %v1006_v12  ;;  %v1177_v24 = vmul.f32 %v1673_v60, %v1999_v6  ;;  %v773_v43 = vmul.f32 %v1639_v42, %v1917_v38  ;;  %v572_v31 = vmul.f32 %v1609_v27, %v1841_v3  ;;  %v2031_v45 = vld [vmem:[#allocation2 + $0xfc] sm:$0xff] }
  0x65   : > { %v905_v10 = vadd.f32 %v873_v23, %v804_v18  ;;  %v704_v49 = vadd.f32 %v672_v21, %v603_v0  ;;  %v503_v2 = vadd.f32 %v471_v7, %v370_v5  ;;  %v874_v1 = vmul.f32 %v1646_v46, %v1927_v39  ;;  %v2049_v23 = vld [vmem:[#allocation2 + $0x10c] sm:$0xff] }
  0x66   : > { %v1208_v35 = vadd.f32 %v1176_v57, %v1107_v53  ;;  %v673_v41 = vmul.f32 %v1626_v34, %v1939_v16  ;;  %v371_v28 = vmul.f32 %v1593_v22, %v1861_v15  ;;  %v472_v20 = vmul.f32 %v1604_v26, %v1863_v25  ;;  %v2047_v25 = vld [vmem:[#allocation2 + $0x10a] sm:$0xff] }
  0x67   : > { %v1007_v19 = vadd.f32 %v975_v14, %v905_v10  ;;  %v805_v59 = vadd.f32 %v773_v43, %v704_v49  ;;  %v604_v52 = vadd.f32 %v572_v31, %v503_v2  ;;  %v976_v3 = vmul.f32 %v1651_v47, %v2019_v44  ;;  %v2059_v21 = vld [vmem:[#allocation2 + $0x110] sm:$0xff] }
  0x68   : > { %1240 = vst.msk [vmem:[%s1753_s14 + $0x58] sm:$0xff] %vm192_vm0, %v1208_v35  ;;  %v1077_v61 = vmul.f32 %v1660_v50, %v2021_v30  ;;  %v774_v11 = vmul.f32 %v1639_v42, %v1941_v62  ;;  %v573_v15 = vmul.f32 %v1609_v27, %v1871_v32  ;;  %v504_v13 = vadd.f32 %v472_v20, %v371_v28  ;;  %v2073_v2 = vld [vmem:[#allocation2 + $0x112] sm:$0xff] }
  0x69   : > { %v1108_v48 = vadd.f32 %v1076_v40, %v1007_v19  ;;  %v906_v57 = vadd.f32 %v874_v1, %v805_v59  ;;  %v705_v29 = vadd.f32 %v673_v41, %v604_v52  ;;  %v1178_v8 = vmul.f32 %v1673_v60, %v2031_v45  ;;  %v2079_v1 = vld [vmem:[#allocation2 + $0x114] sm:$0xff] }
  0x6a   : > { %v875_v9 = vmul.f32 %v1646_v46, %v1943_v37  ;;  %v674_v32 = vmul.f32 %v1626_v34, %v1953_v17  ;;  %v372_v12 = vmul.f32 %v1593_v22, %v1881_v51  ;;  %v605_v0 = vadd.f32 %v573_v15, %v504_v13 }
  0x6b   : > { %v1209_v14 = vadd.f32 %v1177_v24, %v1108_v48  ;;  %v1008_v5 = vadd.f32 %v976_v3, %v906_v57  ;;  %v806_v18 = vadd.f32 %v774_v11, %v705_v29  ;;  %v977_v7 = vmul.f32 %v1651_v47, %v2045_v36  ;;  %v2089_v11 = vld [vmem:[#allocation2 + $0x120] sm:$0xff] }
  0x6c   : > { %v1078_v53 = vmul.f32 %v1660_v50, %v2047_v25  ;;  %v1179_v40 = vmul.f32 %v1673_v60, %v2049_v23  ;;  %v473_v43 = vmul.f32 %v1604_v26, %v1893_v4  ;;  %v706_v10 = vadd.f32 %v674_v32, %v605_v0 }
  0x6d   : > { %1241 = vst.msk [vmem:[%s1753_s14 + $0x60] sm:$0xff] %vm192_vm0, %v1209_v14  ;;  %v1109_v51 = vadd.f32 %v1077_v61, %v1008_v5  ;;  %v907_v24 = vadd.f32 %v875_v9, %v806_v18  ;;  %v775_v49 = vmul.f32 %v1639_v42, %v1969_v56  ;;  %v876_v31 = vmul.f32 %v1646_v46, %v1975_v33  ;;  %v2103_v9 = vld [vmem:[#allocation2 + $0x124] sm:$0xff] }
  0x6e   : > { %v978_v35 = vmul.f32 %v1651_v47, %v2059_v21  ;;  %v505_v4 = vadd.f32 %v473_v43, %v372_v12  ;;  %v574_v41 = vmul.f32 %v1609_v27, %v1895_v63  ;;  %v373_v52 = vmul.f32 %v1593_v22, %v1915_v58 }
  0x6f   : > { %v1210_v28 = vadd.f32 %v1178_v8, %v1109_v51  ;;  %v1009_v19 = vadd.f32 %v977_v7, %v907_v24  ;;  %v807_v59 = vadd.f32 %v775_v49, %v706_v10  ;;  %v1079_v20 = vmul.f32 %v1660_v50, %v2073_v2  ;;  %v2101_v8 = vld [vmem:[#allocation2 + $0x122] sm:$0xff] }
  0x70   : > { %v606_v3 = vadd.f32 %v574_v41, %v505_v4  ;;  %v675_v61 = vmul.f32 %v1626_v34, %v1985_v54  ;;  %v474_v15 = vmul.f32 %v1604_v26, %v1917_v38  ;;  %v1180_v57 = vmul.f32 %v1673_v60, %v2079_v1  ;;  %v2123_v49 = vld [vmem:[#allocation2 + $0x128] sm:$0xff] }
  0x71   : > { %1242 = vst.msk [vmem:[%s1753_s14 + $0x68] sm:$0xff] %vm192_vm0, %v1210_v28  ;;  %v1110_v63 = vadd.f32 %v1078_v53, %v1009_v19  ;;  %v908_v48 = vadd.f32 %v876_v31, %v807_v59  ;;  %v776_v58 = vmul.f32 %v1639_v42, %v1997_v55  ;;  %v877_v13 = vmul.f32 %v1646_v46, %v1999_v6  ;;  %v2125_v31 = vld [vmem:[#allocation2 + $0x12a] sm:$0xff] }
  0x72   : > { %v707_v29 = vadd.f32 %v675_v61, %v606_v3  ;;  %v506_v38 = vadd.f32 %v474_v15, %v373_v52  ;;  %v575_v32 = vmul.f32 %v1609_v27, %v1927_v39  ;;  %v979_v5 = vmul.f32 %v1651_v47, %v2089_v11 }
  0x73   : > { %v1211_v12 = vadd.f32 %v1179_v40, %v1110_v63  ;;  %v1010_v14 = vadd.f32 %v978_v35, %v908_v48  ;;  %v374_v18 = vmul.f32 %v1593_v22, %v1939_v16  ;;  %v676_v53 = vmul.f32 %v1626_v34, %v2019_v44 }
  0x74   : > { %v808_v0 = vadd.f32 %v776_v58, %v707_v29  ;;  %v607_v7 = vadd.f32 %v575_v32, %v506_v38  ;;  %v475_v43 = vmul.f32 %v1604_v26, %v1941_v62  ;;  %v1080_v39 = vmul.f32 %v1660_v50, %v2101_v8  ;;  %v2149_v29 = vld [vmem:[#allocation2 + $0x138] sm:$0xff] }
  0x75   : > { %1243 = vst.msk [vmem:[%s1753_s14 + $0x70] sm:$0xff] %vm192_vm0, %v1211_v12  ;;  %v1111_v51 = vadd.f32 %v1079_v20, %v1010_v14  ;;  %v1181_v40 = vmul.f32 %v1673_v60, %v2103_v9  ;;  %v777_v16 = vmul.f32 %v1639_v42, %v2021_v30  ;;  %v576_v35 = vmul.f32 %v1609_v27, %v1943_v37  ;;  %v2135_v20 = vld [vmem:[#allocation2 + $0x12c] sm:$0xff] }
  0x76   : > { %v909_v24 = vadd.f32 %v877_v13, %v808_v0  ;;  %v708_v10 = vadd.f32 %v676_v53, %v607_v7  ;;  %v507_v62 = vadd.f32 %v475_v43, %v374_v18  ;;  %v878_v41 = vmul.f32 %v1646_v46, %v2031_v45  ;;  %v2153_v13 = vld [vmem:[#allocation2 + $0x13c] sm:$0xff] }
  0x77   : > { %v1212_v4 = vadd.f32 %v1180_v57, %v1111_v51  ;;  %v677_v28 = vmul.f32 %v1626_v34, %v2045_v36  ;;  %v375_v19 = vmul.f32 %v1593_v22, %v1953_v17  ;;  %v476_v61 = vmul.f32 %v1604_v26, %v1969_v56  ;;  %v2151_v56 = vld [vmem:[#allocation2 + $0x13a] sm:$0xff] }
  0x78   : > { %v1011_v59 = vadd.f32 %v979_v5, %v909_v24  ;;  %v809_v52 = vadd.f32 %v777_v16, %v708_v10  ;;  %v608_v3 = vadd.f32 %v576_v35, %v507_v62  ;;  %v980_v37 = vmul.f32 %v1651_v47, %v2123_v49  ;;  %v2163_v53 = vld [vmem:[#allocation2 + $0x140] sm:$0xff] }
  0x79   : > { %1244 = vst.msk [vmem:[%s1753_s14 + $0x78] sm:$0xff] %vm192_vm0, %v1212_v4  ;;  %v1081_v15 = vmul.f32 %v1660_v50, %v2125_v31  ;;  %v778_v63 = vmul.f32 %v1639_v42, %v2047_v25  ;;  %v577_v17 = vmul.f32 %v1609_v27, %v1975_v33  ;;  %v508_v38 = vadd.f32 %v476_v61, %v375_v19  ;;  %v2177_v62 = vld [vmem:[#allocation2 + $0x142] sm:$0xff] }
  0x7a   : > { %v1112_v48 = vadd.f32 %v1080_v39, %v1011_v59  ;;  %v910_v57 = vadd.f32 %v878_v41, %v809_v52  ;;  %v709_v58 = vadd.f32 %v677_v28, %v608_v3  ;;  %v1182_v32 = vmul.f32 %v1673_v60, %v2135_v20  ;;  %v2183_v41 = vld [vmem:[#allocation2 + $0x144] sm:$0xff] }
  0x7b   : > { %v879_v12 = vmul.f32 %v1646_v46, %v2049_v23  ;;  %v678_v33 = vmul.f32 %v1626_v34, %v2059_v21  ;;  %v376_v14 = vmul.f32 %v1593_v22, %v1985_v54  ;;  %v609_v7 = vadd.f32 %v577_v17, %v508_v38 }
  0x7c   : > { %v1213_v5 = vadd.f32 %v1181_v40, %v1112_v48  ;;  %v1012_v18 = vadd.f32 %v980_v37, %v910_v57  ;;  %v810_v0 = vadd.f32 %v778_v63, %v709_v58  ;;  %v981_v43 = vmul.f32 %v1651_v47, %v2149_v29  ;;  %v2193_v63 = vld [vmem:[#allocation2 + $0x150] sm:$0xff] }
  0x7d   : > { %v1082_v51 = vmul.f32 %v1660_v50, %v2151_v56  ;;  %v1183_v39 = vmul.f32 %v1673_v60, %v2153_v13  ;;  %v477_v16 = vmul.f32 %v1604_v26, %v1997_v55  ;;  %v710_v24 = vadd.f32 %v678_v33, %v609_v7 }
  0x7e   : > { %1245 = vst.msk [vmem:[%s1753_s14 + $0x80] sm:$0xff] %vm192_vm0, %v1213_v5  ;;  %v1113_v54 = vadd.f32 %v1081_v15, %v1012_v18  ;;  %v911_v40 = vadd.f32 %v879_v12, %v810_v0  ;;  %v779_v10 = vmul.f32 %v1639_v42, %v2073_v2  ;;  %v880_v35 = vmul.f32 %v1646_v46, %v2079_v1  ;;  %v2207_v12 = vld [vmem:[#allocation2 + $0x154] sm:$0xff] }
  0x7f   : > { %v982_v4 = vmul.f32 %v1651_v47, %v2163_v53  ;;  %v509_v55 = vadd.f32 %v477_v16, %v376_v14  ;;  %v578_v28 = vmul.f32 %v1609_v27, %v1999_v6  ;;  %v377_v3 = vmul.f32 %v1593_v22, %v2019_v44 }
  0x80   : > { %v1214_v19 = vadd.f32 %v1182_v32, %v1113_v54  ;;  %v1013_v59 = vadd.f32 %v981_v43, %v911_v40  ;;  %v811_v52 = vadd.f32 %v779_v10, %v710_v24  ;;  %v1083_v61 = vmul.f32 %v1660_v50, %v2177_v62  ;;  %v2205_v32 = vld [vmem:[#allocation2 + $0x152] sm:$0xff] }
  0x81   : > { %v610_v37 = vadd.f32 %v578_v28, %v509_v55  ;;  %v679_v15 = vmul.f32 %v1626_v34, %v2089_v11  ;;  %v478_v17 = vmul.f32 %v1604_v26, %v2021_v30  ;;  %v1184_v57 = vmul.f32 %v1673_v60, %v2183_v41  ;;  %v2227_v10 = vld [vmem:[#allocation2 + $0x158] sm:$0xff] }
  0x82   : > { %1246 = vst.msk [vmem:[%s1753_s14 + $0x88] sm:$0xff] %vm192_vm0, %v1214_v19  ;;  %v1114_v6 = vadd.f32 %v1082_v51, %v1013_v59  ;;  %v912_v48 = vadd.f32 %v880_v35, %v811_v52  ;;  %v780_v44 = vmul.f32 %v1639_v42, %v2101_v8  ;;  %v881_v38 = vmul.f32 %v1646_v46, %v2103_v9  ;;  %v2229_v35 = vld [vmem:[#allocation2 + $0x15a] sm:$0xff] }
  0x83   : > { %v711_v58 = vadd.f32 %v679_v15, %v610_v37  ;;  %v510_v30 = vadd.f32 %v478_v17, %v377_v3  ;;  %v579_v33 = vmul.f32 %v1609_v27, %v2031_v45  ;;  %v983_v18 = vmul.f32 %v1651_v47, %v2193_v63 }
  0x84   : > { %v1215_v14 = vadd.f32 %v1183_v39, %v1114_v6  ;;  %v1014_v5 = vadd.f32 %v982_v4, %v912_v48  ;;  %v378_v0 = vmul.f32 %v1593_v22, %v2045_v36  ;;  %v680_v51 = vmul.f32 %v1626_v34, %v2123_v49  ;;  %v2258_v48 = vld [vmem:[#allocation2 + $0x168] sm:$0xff] }
  0x85   : > { %v812_v7 = vadd.f32 %v780_v44, %v711_v58  ;;  %v611_v43 = vadd.f32 %v579_v33, %v510_v30  ;;  %v479_v16 = vmul.f32 %v1604_v26, %v2047_v25  ;;  %v1084_v45 = vmul.f32 %v1660_v50, %v2205_v32  ;;  %v2262_v44 = vld [vmem:[#allocation2 + $0x16c] sm:$0xff]  ;;  %v2273_v30 = vld [vmem:[%s2518_s1] ss:$0 sm:$0xff] }
  0x86   : > { %1247 = vst.msk [vmem:[%s1753_s14 + $0x90] sm:$0xff] %vm192_vm0, %v1215_v14  ;;  %v1115_v54 = vadd.f32 %v1083_v61, %v1014_v5  ;;  %v1185_v39 = vmul.f32 %v1673_v60, %v2207_v12  ;;  %v781_v36 = vmul.f32 %v1639_v42, %v2125_v31  ;;  %v580_v4 = vmul.f32 %v1609_v27, %v2049_v23  ;;  %v2239_v61 = vld [vmem:[#allocation2 + $0x15c] sm:$0xff] }
  0x87   : > { %v913_v40 = vadd.f32 %v881_v38, %v812_v7  ;;  %v712_v24 = vadd.f32 %v680_v51, %v611_v43  ;;  %v511_v25 = vadd.f32 %v479_v16, %v378_v0  ;;  %v882_v28 = vmul.f32 %v1646_v46, %v2135_v20  ;;  %v2277_v7 = vld [vmem:[#allocation2 + $0x170] sm:$0xff]  ;;  %v2288_v16 = vld [vmem:[%s2518_s1 + $0x1] ss:$0 sm:$0xff] }
  0x88   : > { %v1216_v55 = vadd.f32 %v1184_v57, %v1115_v54  ;;  %v681_v19 = vmul.f32 %v1626_v34, %v2149_v29  ;;  %v379_v59 = vmul.f32 %v1593_v22, %v2059_v21  ;;  %v480_v15 = vmul.f32 %v1604_v26, %v2073_v2  ;;  %v2254_v22 = vld [vmem:[%s2518_s1 + $0x2] ss:$0 sm:$0xff]  ;;  %v2260_v57 = vld [vmem:[#allocation2 + $0x16a] sm:$0xff] }
  0x89   : > { %v1015_v52 = vadd.f32 %v983_v18, %v913_v40  ;;  %v813_v3 = vadd.f32 %v781_v36, %v712_v24  ;;  %v612_v37 = vadd.f32 %v580_v4, %v511_v25  ;;  %v984_v27 = vmul.f32 %v1651_v47, %v2227_v10  ;;  %v2301_v36 = vld [vmem:[#allocation2 + $0x172] sm:$0xff] }
  0x8a   : > { %1248 = vst.msk [vmem:[%s1753_s14 + $0x98] sm:$0xff] %vm192_vm0, %v1216_v55  ;;  %v1085_v23 = vmul.f32 %v1660_v50, %v2229_v35  ;;  %v782_v17 = vmul.f32 %v1639_v42, %v2151_v56  ;;  %v581_v21 = vmul.f32 %v2254_v22, %v2079_v1  ;;  %v512_v58 = vadd.f32 %v480_v15, %v379_v59  ;;  %v2307_v24 = vld [vmem:[#allocation2 + $0x174] sm:$0xff] }
  0x8b   : > { %v1116_v26 = vadd.f32 %v1084_v45, %v1015_v52  ;;  %v914_v2 = vadd.f32 %v882_v28, %v813_v3  ;;  %v713_v6 = vadd.f32 %v681_v19, %v612_v37  ;;  %v1186_v42 = vmul.f32 %v1673_v60, %v2239_v61  ;;  %v2323_v3 = vld [vmem:[%s2518_s1 + $0x3] ss:$0 sm:$0xff] }
  0x8c   : > { %v883_v38 = vmul.f32 %v1646_v46, %v2153_v13  ;;  %v682_v1 = vmul.f32 %v1626_v34, %v2163_v53  ;;  %v380_v33 = vmul.f32 %v2273_v30, %v2089_v11  ;;  %v613_v0 = vadd.f32 %v581_v21, %v512_v58  ;;  %v2327_v37 = vld [vmem:[#allocation2 + $0x180] sm:$0xff] }
  0x8d   : > { %v1217_v14 = vadd.f32 %v1185_v39, %v1116_v26  ;;  %v1016_v5 = vadd.f32 %v984_v27, %v914_v2  ;;  %v814_v18 = vadd.f32 %v782_v17, %v713_v6  ;;  %v985_v43 = vmul.f32 %v1651_v47, %v2258_v48  ;;  %v2349_v6 = vld [vmem:[#allocation2 + $0x182] sm:$0xff] }
  0x8e   : > { %v1086_v34 = vmul.f32 %v1660_v50, %v2260_v57  ;;  %v1187_v51 = vmul.f32 %v1673_v60, %v2262_v44  ;;  %v481_v11 = vmul.f32 %v2288_v16, %v2101_v8  ;;  %v714_v39 = vadd.f32 %v682_v1, %v613_v0  ;;  %v2297_v50 = vld [vmem:[%s2518_s1 + $0x4] ss:$0 sm:$0xff] }
  0x8f   : > { %1249 = vst.msk [vmem:[%s1753_s14 + $0xa0] sm:$0xff] %vm192_vm0, %v1217_v14  ;;  %v1117_v54 = vadd.f32 %v1085_v23, %v1016_v5  ;;  %v915_v45 = vadd.f32 %v883_v38, %v814_v18  ;;  %v783_v60 = vmul.f32 %v2297_v50, %v2177_v62  ;;  %v884_v40 = vmul.f32 %v1646_v46, %v2183_v41  ;;  %v2316_v46 = vld [vmem:[%s2518_s1 + $0x7] ss:$0 sm:$0xff]  ;;  %v2336_v23 = vld [vmem:[%s2518_s1 + $0x8] ss:$0 sm:$0xff] }
  0x90   : > { %v986_v8 = vmul.f32 %v1651_v47, %v2277_v7  ;;  %v513_v25 = vadd.f32 %v481_v11, %v380_v33  ;;  %v582_v4 = vmul.f32 %v2254_v22, %v2103_v9  ;;  %v381_v59 = vmul.f32 %v2273_v30, %v2123_v49  ;;  %v2351_v58 = vld [vmem:[#allocation2 + $0x184] sm:$0xff] }
  0x91   : > { %v1218_v55 = vadd.f32 %v1186_v42, %v1117_v54  ;;  %v1017_v28 = vadd.f32 %v985_v43, %v915_v45  ;;  %v815_v19 = vadd.f32 %v783_v60, %v714_v39  ;;  %v1087_v47 = vmul.f32 %v2316_v46, %v2301_v36  ;;  %v2358_v14 = vld [vmem:[%s2518_s1 + $0x6] ss:$0 sm:$0xff]  ;;  %v2376_v60 = vld [vmem:[#allocation2 + $0x188] sm:$0xff] }
  0x92   : > { %v614_v52 = vadd.f32 %v582_v4, %v513_v25  ;;  %v683_v9 = vmul.f32 %v2323_v3, %v2193_v63  ;;  %v482_v49 = vmul.f32 %v2288_v16, %v2125_v31  ;;  %v1188_v17 = vmul.f32 %v2336_v23, %v2307_v24  ;;  %v2345_v31 = vld [vmem:[%s2518_s1 + $0x5] ss:$0 sm:$0xff] }
  0x93   : > { %1250 = vst.msk [vmem:[%s1753_s14 + $0xa8] sm:$0xff] %vm192_vm0, %v1218_v55  ;;  %v1118_v15 = vadd.f32 %v1086_v34, %v1017_v28  ;;  %v916_v27 = vadd.f32 %v884_v40, %v815_v19  ;;  %v784_v21 = vmul.f32 %v2297_v50, %v2205_v32  ;;  %v885_v2 = vmul.f32 %v2345_v31, %v2207_v12  ;;  %v2378_v40 = vld [vmem:[#allocation2 + $0x18a] sm:$0xff] }
  0x94   : > { %v715_v26 = vadd.f32 %v683_v9, %v614_v52  ;;  %v514_v42 = vadd.f32 %v482_v49, %v381_v59  ;;  %v583_v38 = vmul.f32 %v2254_v22, %v2135_v20  ;;  %v987_v5 = vmul.f32 %v2358_v14, %v2327_v37 }
  0x95   : > { %v1219_v1 = vadd.f32 %v1187_v51, %v1118_v15  ;;  %v1018_v33 = vadd.f32 %v986_v8, %v916_v27  ;;  %v382_v18 = vmul.f32 %v2273_v30, %v2149_v29  ;;  %v684_v34 = vmul.f32 %v2323_v3, %v2227_v10 }
  0x96   : > { %v816_v0 = vadd.f32 %v784_v21, %v715_v26  ;;  %v615_v43 = vadd.f32 %v583_v38, %v514_v42  ;;  %v483_v20 = vmul.f32 %v2288_v16, %v2151_v56  ;;  %v1088_v11 = vmul.f32 %v2316_v46, %v2349_v6  ;;  %v2402_v26 = vld [vmem:[#allocation2 + $0x198] sm:$0xff] }
  0x97   : > { %1251 = vst.msk [vmem:[%s1753_s14 + $0xb0] sm:$0xff] %vm192_vm0, %v1219_v1  ;;  %v1119_v51 = vadd.f32 %v1087_v47, %v1018_v33  ;;  %v1189_v54 = vmul.f32 %v2336_v23, %v2351_v58  ;;  %v785_v29 = vmul.f32 %v2297_v50, %v2229_v35  ;;  %v584_v8 = vmul.f32 %v2254_v22, %v2153_v13  ;;  %v2388_v47 = vld [vmem:[#allocation2 + $0x18c] sm:$0xff] }
  0x98   : > { %v917_v45 = vadd.f32 %v885_v2, %v816_v0  ;;  %v716_v39 = vadd.f32 %v684_v34, %v615_v43  ;;  %v515_v56 = vadd.f32 %v483_v20, %v382_v18  ;;  %v886_v4 = vmul.f32 %v2345_v31, %v2239_v61  ;;  %v2406_v2 = vld [vmem:[#allocation2 + $0x19c] sm:$0xff] }
  0x99   : > { %v1220_v25 = vadd.f32 %v1188_v17, %v1119_v51  ;;  %v685_v55 = vmul.f32 %v2323_v3, %v2258_v48  ;;  %v383_v28 = vmul.f32 %v2273_v30, %v2163_v53  ;;  %v484_v9 = vmul.f32 %v2288_v16, %v2177_v62  ;;  %v2404_v62 = vld [vmem:[#allocation2 + $0x19a] sm:$0xff] }
  0x9a   : > { %v1019_v19 = vadd.f32 %v987_v5, %v917_v45  ;;  %v817_v59 = vadd.f32 %v785_v29, %v716_v39  ;;  %v616_v52 = vadd.f32 %v584_v8, %v515_v56  ;;  %v988_v13 = vmul.f32 %v2358_v14, %v2376_v60  ;;  %v953_v39 = vld [vmem:[#allocation2 + $0x1a0] sm:$0xff] }
  0x9b   : > { %1252 = vst.msk [vmem:[%s1753_s14 + $0xb8] sm:$0xff] %vm192_vm0, %v1220_v25  ;;  %v1089_v49 = vmul.f32 %v2316_v46, %v2378_v40  ;;  %v786_v15 = vmul.f32 %v2297_v50, %v2260_v57  ;;  %v585_v53 = vmul.f32 %v2254_v22, %v2183_v41  ;;  %v516_v42 = vadd.f32 %v484_v9, %v383_v28  ;;  %v2428_v56 = vld [vmem:[#allocation2 + $0x1a2] sm:$0xff] }
  0x9c   : > { %v1120_v27 = vadd.f32 %v1088_v11, %v1019_v19  ;;  %v918_v17 = vadd.f32 %v886_v4, %v817_v59  ;;  %v717_v21 = vadd.f32 %v685_v55, %v616_v52  ;;  %v1190_v38 = vmul.f32 %v2336_v23, %v2388_v47  ;;  %v2432_v25 = vld [vmem:[#allocation2 + $0x1a4] sm:$0xff] }
  0x9d   : > { %v887_v1 = vmul.f32 %v2345_v31, %v2262_v44  ;;  %v686_v41 = vmul.f32 %v2323_v3, %v2277_v7  ;;  %v384_v33 = vmul.f32 %v2273_v30, %v2193_v63  ;;  %v617_v43 = vadd.f32 %v585_v53, %v516_v42 }
  0x9e   : > { %v1221_v5 = vadd.f32 %v1189_v54, %v1120_v27  ;;  %v1020_v18 = vadd.f32 %v988_v13, %v918_v17  ;;  %v818_v0 = vadd.f32 %v786_v15, %v717_v21  ;;  %v989_v34 = vmul.f32 %v2358_v14, %v2402_v26  ;;  %v1055_v21 = vld [vmem:[#allocation2 + $0x1b2] sm:$0xff] }
  0x9f   : > { %v1090_v20 = vmul.f32 %v2316_v46, %v2404_v62  ;;  %v1191_v51 = vmul.f32 %v2336_v23, %v2406_v2  ;;  %v485_v11 = vmul.f32 %v2288_v16, %v2205_v32  ;;  %v718_v54 = vadd.f32 %v686_v41, %v617_v43  ;;  %v955_v43 = vld [vmem:[#allocation2 + $0x1b8] sm:$0xff] }
  0xa0   : > { %1253 = vst.msk [vmem:[%s1753_s14 + $0xc0] sm:$0xff] %vm192_vm0, %v1221_v5  ;;  %v1121_v29 = vadd.f32 %v1089_v49, %v1020_v18  ;;  %v919_v63 = vadd.f32 %v887_v1, %v818_v0  ;;  %v787_v45 = vmul.f32 %v2297_v50, %v2301_v36  ;;  %v888_v8 = vmul.f32 %v2345_v31, %v2307_v24 }
  0xa1   : > { %v517_v4 = vadd.f32 %v485_v11, %v384_v33  ;;  %v586_v32 = vmul.f32 %v2254_v22, %v2207_v12  ;;  %v687_v55 = vmul.f32 %v2323_v3, %v2327_v37  ;;  %v385_v52 = vmul.f32 %v2273_v30, %v2227_v10  ;;  %v954_v10 = vld [vmem:[#allocation2 + $0x1b0] sm:$0xff] }
  0xa2   : > { %v1222_v28 = vadd.f32 %v1190_v38, %v1121_v29  ;;  %v1021_v19 = vadd.f32 %v989_v34, %v919_v63  ;;  %v819_v59 = vadd.f32 %v787_v45, %v718_v54  ;;  %v990_v9 = vmul.f32 %v2358_v14, %v953_v39 }
  0xa3   : > { %v1091_v13 = vmul.f32 %v2316_v46, %v2428_v56  ;;  %v618_v49 = vadd.f32 %v586_v32, %v517_v4  ;;  %v486_v15 = vmul.f32 %v2288_v16, %v2229_v35  ;;  %v1192_v37 = vmul.f32 %v2336_v23, %v2432_v25 }
  0xa4   : > { %1254 = vst.msk [vmem:[%s1753_s14 + $0xc8] sm:$0xff] %vm192_vm0, %v1222_v28  ;;  %v1122_v12 = vadd.f32 %v1090_v20, %v1021_v19  ;;  %v920_v53 = vadd.f32 %v888_v8, %v819_v59  ;;  %v788_v27 = vmul.f32 %v2297_v50, %v2349_v6  ;;  %v587_v38 = vmul.f32 %v2254_v22, %v2239_v61 }
  0xa5   : > { %v719_v17 = vadd.f32 %v687_v55, %v618_v49  ;;  %v518_v42 = vadd.f32 %v486_v15, %v385_v52  ;;  %v688_v35 = vmul.f32 %v2323_v3, %v2376_v60  ;;  %v889_v33 = vmul.f32 %v2345_v31, %v2351_v58  ;;  %v956_v55 = vld [vmem:[#allocation2 + $0x1c8] sm:$0xff]  ;;  %v1157_v52 = vld [vmem:[#allocation2 + $0x1bc] sm:$0xff] }
  0xa6   : > { %v1223_v1 = vadd.f32 %v1191_v51, %v1122_v12  ;;  %v1022_v41 = vadd.f32 %v990_v9, %v920_v53  ;;  %v386_v5 = vmul.f32 %v2273_v30, %v2258_v48  ;;  %v991_v18 = vmul.f32 %v2358_v14, %v954_v10  ;;  %v1156_v51 = vld [vmem:[#allocation2 + $0x1b4] sm:$0xff]  ;;  %v1057_v53 = vld [vmem:[#allocation2 + $0x1ca] sm:$0xff] }
  0xa7   : > { %v820_v6 = vadd.f32 %v788_v27, %v719_v17  ;;  %v619_v0 = vadd.f32 %v587_v38, %v518_v42  ;;  %v487_v34 = vmul.f32 %v2288_v16, %v2260_v57  ;;  %v1092_v60 = vmul.f32 %v2316_v46, %v1055_v21  ;;  %v1158_v17 = vld [vmem:[#allocation2 + $0x1cc] sm:$0xff] }
  0xa8   : > { %1255 = vst.msk [vmem:[%s1753_s14 + $0xd0] sm:$0xff] %vm192_vm0, %v1223_v1  ;;  %v1123_v61 = vadd.f32 %v1091_v13, %v1022_v41  ;;  %v789_v20 = vmul.f32 %v2297_v50, %v2378_v40  ;;  %v588_v58 = vmul.f32 %v2254_v22, %v2262_v44  ;;  %v689_v63 = vmul.f32 %v2323_v3, %v2402_v26  ;;  %v1056_v44 = vld [vmem:[#allocation2 + $0x1ba] sm:$0xff]  ;;  %v1058_v41 = vld [vmem:[#allocation2 + $0x1d2] sm:$0xff] }
  0xa9   : > { %v921_v48 = vadd.f32 %v889_v33, %v820_v6  ;;  %v720_v11 = vadd.f32 %v688_v35, %v619_v0  ;;  %v519_v29 = vadd.f32 %v487_v34, %v386_v5  ;;  %v890_v54 = vmul.f32 %v2345_v31, %v2388_v47 }
  0xaa   : > { %v1224_v57 = vadd.f32 %v1192_v37, %v1123_v61  ;;  %v992_v45 = vmul.f32 %v2358_v14, %v955_v43  ;;  %v387_v40 = vmul.f32 %v2273_v30, %v2277_v7  ;;  %v488_v28 = vmul.f32 %v2288_v16, %v2301_v36 }
  0xab   : > { %v1023_v8 = vadd.f32 %v991_v18, %v921_v48  ;;  %v821_v4 = vadd.f32 %v789_v20, %v720_v11  ;;  %v620_v32 = vadd.f32 %v588_v58, %v519_v29  ;;  %v1193_v26 = vmul.f32 %v2336_v23, %v1156_v51 }
  0xac   : > { %1256 = vst.msk [vmem:[%s1753_s14 + $0xd8] sm:$0xff] %vm192_vm0, %v1224_v57  ;;  %v790_v47 = vmul.f32 %v2297_v50, %v2404_v62  ;;  %v589_v19 = vmul.f32 %v2254_v22, %v2307_v24  ;;  %v690_v30 = vmul.f32 %v2323_v3, %v953_v39  ;;  %v520_v13 = vadd.f32 %v488_v28, %v387_v40  ;;  %v957_v3 = vld [vmem:[#allocation2 + $0x1d0] sm:$0xff] }
  0xad   : > { %v1124_v7 = vadd.f32 %v1092_v60, %v1023_v8  ;;  %v922_v59 = vadd.f32 %v890_v54, %v821_v4  ;;  %v721_v9 = vadd.f32 %v689_v63, %v620_v32  ;;  %v1093_v16 = vmul.f32 %v2316_v46, %v1056_v44 }
  0xae   : > { %v891_v36 = vmul.f32 %v2345_v31, %v2406_v2  ;;  %v993_v49 = vmul.f32 %v2358_v14, %v956_v55  ;;  %v621_v22 = vadd.f32 %v589_v19, %v520_v13  ;;  %v1194_v24 = vmul.f32 %v2336_v23, %v1157_v52 }
  0xaf   : > { %v1225_v15 = vadd.f32 %v1193_v26, %v1124_v7  ;;  %v1024_v62 = vadd.f32 %v992_v45, %v922_v59  ;;  %v822_v12 = vadd.f32 %v790_v47, %v721_v9  ;;  %v791_v10 = vmul.f32 %v2297_v50, %v2428_v56  ;;  %v1159_v56 = vld [vmem:[#allocation2 + $0x1d4] sm:$0xff] }
  0xb0   : > { %v722_v27 = vadd.f32 %v690_v30, %v621_v22  ;;  %v1094_v2 = vmul.f32 %v2316_v46, %v1057_v53  ;;  %v892_v21 = vmul.f32 %v2345_v31, %v2432_v25  ;;  %v994_v1 = vmul.f32 %v2358_v14, %v957_v3 }
  0xb1   : > { %1257 = vst.msk [vmem:[%s1753_s14 + $0xe0] sm:$0xff] %vm192_vm0, %v1225_v15  ;;  %v1125_v39 = vadd.f32 %v1093_v16, %v1024_v62  ;;  %v923_v37 = vadd.f32 %v891_v36, %v822_v12  ;;  %v1195_v5 = vmul.f32 %v2336_v23, %v1158_v17  ;;  %v1095_v0 = vmul.f32 %v2316_v46, %v1058_v41 }
  0xb2   : > { %v823_v35 = vadd.f32 %v791_v10, %v722_v27  ;;  %v1196_v25 = vmul.f32 %v2336_v23, %v1159_v56 }
  0xb3   : > { %v1226_v42 = vadd.f32 %v1194_v24, %v1125_v39  ;;  %v1025_v38 = vadd.f32 %v993_v49, %v923_v37 }
  0xb4   : > { %v924_v50 = vadd.f32 %v892_v21, %v823_v35 }
  0xb5   : > { %1258 = vst.msk [vmem:[%s1753_s14 + $0xe8] sm:$0xff] %vm192_vm0, %v1226_v42  ;;  %v1126_v33 = vadd.f32 %v1094_v2, %v1025_v38 }
  0xb6   : > { %v1026_v18 = vadd.f32 %v994_v1, %v924_v50 }
  0xb7   : > { %v1227_v6 = vadd.f32 %v1195_v5, %v1126_v33 }
  0xb8   : > { %v1127_v31 = vadd.f32 %v1095_v0, %v1026_v18 }
  0xb9   : > { %1259 = vst.msk [vmem:[%s1753_s14 + $0xf0] sm:$0xff] %vm192_vm0, %v1227_v6 }
  0xba   : > { %v1228_v43 = vadd.f32 %v1196_v25, %v1127_v31 }
  0xbc   : > { %1260 = vst.msk [vmem:[%s1753_s14 + $0xf8] sm:$0xff] %vm192_vm0, %v1228_v43 }
  0xbd PF: > { %s12_s11 = sadd.s32 1, %s1439_s11   ;;  %s2520_s9 = smov %s1435_s10 }
  0xbe   : > { %p9_p5 = scmp.ge.s32.totalorder %s12_s11, 4   ;;  %s2521_s10 = smov %s2523_s12 }
  0xc0   :  { %11 = sbr.rel (!%p9_p5) target bundleno = 2 (0x2), region = 63 }

</bundles_post_ra>
